<compile_context>
chip_gen: v6e
topology: v6e:2x2x1
jax: 0.10.0
libtpu: 0.0.40
codegen_flags: <defaults>
</compile_context>

<pallas_src>
import functools
import math

import jax
import jax.numpy as jnp
from jax.experimental import pallas as pl
from jax.experimental.pallas import tpu as pltpu


# ----------------------------------------------------------------------------
# In-kernel helpers
# ----------------------------------------------------------------------------
def _layer_norm(x, gamma, beta, eps=1e-5):
    mu = jnp.mean(x, axis=-1, keepdims=True)
    var = jnp.mean(jnp.square(x - mu), axis=-1, keepdims=True)
    return (x - mu) * jax.lax.rsqrt(var + eps) * gamma + beta


# ----------------------------------------------------------------------------
# Fused encoder-stack kernel: grid = (batch_blocks, num_layers)
# The activation is resident in out_ref across the (arbitrary) layer axis.
# ----------------------------------------------------------------------------
def encoder_stack_kernel(
    peaks_ref, kbias_ref, emb_w_ref, emb_b_ref,
    wqkv_ref, bqkv_ref, wo_ref, bo_ref,
    g1_ref, be1_ref,
    w1_ref, b1_ref, w2_ref, b2_ref,
    g2_ref, be2_ref,
    out_ref,
    *, n_head: int, head_dim: int, n_seq: int, seq_len: int,
):
    layer = pl.program_id(1)
    bf16 = jnp.bfloat16
    dh, nH, Bg, S = head_dim, n_head, n_seq, seq_len

    # ---- embedding (stand-in linear embed), only on the first layer --------
    @pl.when(layer == 0)
    def _():
        out_ref[...] = (peaks_ref[...] * emb_w_ref[...] + emb_b_ref[...])

    x = out_ref[...]                                   # (R, D) f32, resident
    R, D = x.shape

    # ---- fused QKV projection: one lane-dense matmul ------------------------
    x_bf = x.astype(bf16)
    qkv = jnp.dot(x_bf, wqkv_ref[0],
                  preferred_element_type=jnp.float32) + bqkv_ref[0]  # (R, 3D)
    # column layout: [ q (D) | k (D) | v (D) ], head h at [h*dh:(h+1)*dh]
    # 1/sqrt(dh) is already folded into the q columns / bias on the host.

    kbias = kbias_ref[0]                               # (Bg, 1, S) additive bias

    # ---- per-sequence attention (batch is the einsum batch axis) -----------
    ctx_heads = []
    for h in range(nH):
        qh = qkv[:, h * dh:(h + 1) * dh].reshape(Bg, S, dh).astype(bf16)
        kh = qkv[:, D + h * dh:D + (h + 1) * dh].reshape(Bg, S, dh).astype(bf16)
        vh = qkv[:, 2 * D + h * dh:2 * D + (h + 1) * dh].reshape(Bg, S, dh).astype(bf16)

        s = jnp.einsum("bqd,bkd->bqk", qh, kh,
                       preferred_element_type=jnp.float32)            # (Bg,S,S)
        s = s + kbias                                                  # key padding

        m = jnp.max(s, axis=-1, keepdims=True)
        p = jnp.exp(s - m)
        p = p * pl.reciprocal(jnp.sum(p, axis=-1, keepdims=True), approx=True)

        ctx = jnp.einsum("bqk,bkd->bqd", p.astype(bf16), vh,
                         preferred_element_type=jnp.float32)           # (Bg,S,dh)
        ctx_heads.append(ctx.reshape(R, dh))

    ctx_all = jnp.concatenate(ctx_heads, axis=-1)                      # (R, D)

    # Output projection: single K=D contraction (concat(heads) @ Wo + bo).
    attn = jnp.dot(ctx_all.astype(bf16), wo_ref[0],
                   preferred_element_type=jnp.float32) + bo_ref[0]

    # residual + layernorm 1 (post-norm; dropout = identity in eval)
    y = _layer_norm(x + attn, g1_ref[0], be1_ref[0])

    # ---- feed-forward (relu) -------------------------------------------------
    h1 = jnp.dot(y.astype(bf16), w1_ref[0],
                 preferred_element_type=jnp.float32) + b1_ref[0]
    h1 = jnp.maximum(h1, 0.0)
    ff = jnp.dot(h1.astype(bf16), w2_ref[0],
                 preferred_element_type=jnp.float32) + b2_ref[0]

    # residual + layernorm 2; write back into the resident output block.
    out_ref[...] = _layer_norm(y + ff, g2_ref[0], be2_ref[0])


# ----------------------------------------------------------------------------
# Host-side parameter init / packing (QKV fusion, scale folding, bf16 cast)
# ----------------------------------------------------------------------------
def init_layer_params(key, d_model, dim_ff):
    ks = jax.random.split(key, 6)
    s = 0.02
    f32 = jnp.float32
    return {
        "wq": jax.random.normal(ks[0], (d_model, d_model), f32) * s,
        "bq": jnp.zeros((d_model,), f32),
        "wk": jax.random.normal(ks[1], (d_model, d_model), f32) * s,
        "bk": jnp.zeros((d_model,), f32),
        "wv": jax.random.normal(ks[2], (d_model, d_model), f32) * s,
        "bv": jnp.zeros((d_model,), f32),
        "wo": jax.random.normal(ks[3], (d_model, d_model), f32) * s,
        "bo": jnp.zeros((d_model,), f32),
        "ln1_g": jnp.ones((d_model,), f32),
        "ln1_b": jnp.zeros((d_model,), f32),
        "w1": jax.random.normal(ks[4], (d_model, dim_ff), f32) * s,
        "b1": jnp.zeros((dim_ff,), f32),
        "w2": jax.random.normal(ks[5], (dim_ff, d_model), f32) * s,
        "b2": jnp.zeros((d_model,), f32),
        "ln2_g": jnp.ones((d_model,), f32),
        "ln2_b": jnp.zeros((d_model,), f32),
    }


def pack_params(layer_params, n_head):
    """Stack per-layer params on a leading axis, fuse QKV into one (D, 3D)
    weight, fold the attention scale into the q columns, cast MXU weights
    to bf16."""
    D = layer_params[0]["wq"].shape[0]
    dh = D // n_head
    scale = 1.0 / float(dh) ** 0.5
    bf16 = jnp.bfloat16

    acc = {k: [] for k in ("wqkv", "bqkv", "wo", "bo", "ln1_g", "ln1_b",
                           "w1", "b1", "w2", "b2", "ln2_g", "ln2_b")}
    for p in layer_params:
        wqkv = jnp.concatenate([p["wq"] * scale, p["wk"], p["wv"]], axis=1)  # (D,3D)
        bqkv = jnp.concatenate([p["bq"] * scale, p["bk"], p["bv"]])          # (3D,)
        acc["wqkv"].append(wqkv)
        acc["bqkv"].append(bqkv[None, :])
        acc["wo"].append(p["wo"])
        acc["bo"].append(p["bo"][None, :])
        acc["ln1_g"].append(p["ln1_g"][None, :])
        acc["ln1_b"].append(p["ln1_b"][None, :])
        acc["w1"].append(p["w1"])
        acc["b1"].append(p["b1"][None, :])
        acc["w2"].append(p["w2"])
        acc["b2"].append(p["b2"][None, :])
        acc["ln2_g"].append(p["ln2_g"][None, :])
        acc["ln2_b"].append(p["ln2_b"][None, :])

    def stack(name, dtype=jnp.float32):
        return jnp.stack(acc[name]).astype(dtype)

    return {
        "wqkv": stack("wqkv", bf16), "bqkv": stack("bqkv"),
        "wo": stack("wo", bf16), "bo": stack("bo"),
        "ln1_g": stack("ln1_g"), "ln1_b": stack("ln1_b"),
        "w1": stack("w1", bf16), "b1": stack("b1"),
        "w2": stack("w2", bf16), "b2": stack("b2"),
        "ln2_g": stack("ln2_g"), "ln2_b": stack("ln2_b"),
    }


# ----------------------------------------------------------------------------
# Forward: single fused pallas_call (embedding + all encoder layers)
# ----------------------------------------------------------------------------
def c13nmr_encoder_forward(x, src_mask, emb_w, emb_b, packed, n_head):
    """x: (B, S) peak values; src_mask: (B, S) 1=valid / 0=pad."""
    B, S = x.shape
    D = int(emb_w.shape[0])
    L = int(packed["wqkv"].shape[0])
    FF = int(packed["w1"].shape[-1])
    dh = D // n_head

    # --- generation-dependent batch split -------------------------------------
    kind = jax.devices()[0].device_kind.lower()
    is_v7 = "v7" in kind

    B_pad = B + (B % 2) if is_v7 else B               # pad to even on v7x
    G = 2 if (is_v7 and B_pad % 2 == 0 and ((B_pad // 2) * S) % 8 == 0) else 1
    Bg = B_pad // G
    R = Bg * S

    if B_pad != B:
        x = jnp.concatenate(
            [x, jnp.zeros((B_pad - B, S), x.dtype)], axis=0)
        src_mask = jnp.concatenate(
            [src_mask, jnp.zeros((B_pad - B, S), src_mask.dtype)], axis=0)

    # raw peaks go straight into the kernel; embedding happens at layer 0
    peaks = x.reshape(B_pad * S, 1).astype(jnp.float32)
    emb_w2 = emb_w.reshape(1, D).astype(jnp.float32)
    emb_b2 = emb_b.reshape(1, D).astype(jnp.float32)

    # tiny per-sequence key-padding bias (no (R,R) mask anymore)
    kbias = jnp.where(src_mask != 0, 0.0, -1e9).astype(jnp.float32)
    kbias = kbias.reshape(G, Bg, 1, S)

    def wspec(shape):
        nd = len(shape)
        return pl.BlockSpec((1,) + shape, lambda g, l, _n=nd: (l,) + (0,) * _n)

    in_specs = [
        pl.BlockSpec((R, 1), lambda g, l: (g, 0)),              # raw peaks
        pl.BlockSpec((1, Bg, 1, S), lambda g, l: (g, 0, 0, 0)),  # key-pad bias
        pl.BlockSpec((1, D), lambda g, l: (0, 0)),              # emb_w
        pl.BlockSpec((1, D), lambda g, l: (0, 0)),              # emb_b
        wspec((D, 3 * D)),                                      # wqkv
        wspec((1, 3 * D)),                                      # bqkv
        wspec((D, D)),                                          # wo
        wspec((1, D)),                                          # bo
        wspec((1, D)), wspec((1, D)),                           # ln1 gamma, beta
        wspec((D, FF)), wspec((1, FF)),                         # w1, b1
        wspec((FF, D)), wspec((1, D)),                          # w2, b2
        wspec((1, D)), wspec((1, D)),                           # ln2 gamma, beta
    ]

    # --- VMEM budget: double-buffered weights + resident act + intermediates --
    per_layer_bytes = sum(
        math.prod(v.shape[1:]) * v.dtype.itemsize for v in packed.values())
    inter_bytes = 4 * R * (3 * D + FF + 8 * D) + 4 * n_head * Bg * S * S
    est = 2 * per_layer_bytes + 2 * R * D * 4 + inter_bytes + (4 << 20)
    vmem_cap = (48 << 20) if is_v7 else (100 << 20)
    vmem_limit = int(min(vmem_cap, max(32 << 20, est)))

    out = pl.pallas_call(
        functools.partial(encoder_stack_kernel,
                          n_head=n_head, head_dim=dh, n_seq=Bg, seq_len=S),
        out_shape=jax.ShapeDtypeStruct((B_pad * S, D), jnp.float32),
        grid=(G, L),
        in_specs=in_specs,
        out_specs=pl.BlockSpec((R, D), lambda g, l: (g, 0)),
        compiler_params=pltpu.CompilerParams(
            dimension_semantics=("parallel", "arbitrary"),
            vmem_limit_bytes=vmem_limit),
    )(
        peaks, kbias, emb_w2, emb_b2,
        packed["wqkv"], packed["bqkv"], packed["wo"], packed["bo"],
        packed["ln1_g"], packed["ln1_b"],
        packed["w1"], packed["b1"], packed["w2"], packed["b2"],
        packed["ln2_g"], packed["ln2_b"],
    )
    return out.reshape(B_pad, S, D)[:B]


if __name__ == "__main__":
    B, S = 2, 8
    d_model, dim_ff, n_head, num_layers = 32, 64, 4, 2

    key = jax.random.PRNGKey(0)
    k_x, k_e, *k_layers = jax.random.split(key, 2 + num_layers)

    # synthetic C13 NMR peaks (ppm-like values) and padding mask
    x = jax.random.normal(k_x, (B, S), jnp.float32) * 50.0 + 100.0
    src_mask = jnp.array(
        [[1, 1, 1, 1, 1, 1, 0, 0],
         [1, 1, 1, 1, 0, 0, 0, 0]], dtype=jnp.int32)

    emb_w = jax.random.normal(k_e, (d_model,), jnp.float32) * 0.02
    emb_b = jnp.zeros((d_model,), jnp.float32)
    layer_params = [init_layer_params(k, d_model, dim_ff) for k in k_layers]
    packed = pack_params(layer_params, n_head)

    out = c13nmr_encoder_forward(x, src_mask, emb_w, emb_b, packed, n_head)
    out = jax.block_until_ready(out)

    assert out.shape == (B, S, d_model)
    assert bool(jnp.all(jnp.isfinite(out)))
    print("KERNEL_OK")
</pallas_src>

<mosaic_0001>
module attributes {stable_mosaic.version = 11 : i64} {
  func.func @encoder_stack_kernel(%arg0: i32, %arg1: i32, %arg2: memref<16x1xf32, #tpu.memory_space<vmem>>, %arg3: memref<1x2x1x8xf32, #tpu.memory_space<vmem>>, %arg4: memref<1x32xf32, #tpu.memory_space<vmem>>, %arg5: memref<1x32xf32, #tpu.memory_space<vmem>>, %arg6: memref<1x32x96xbf16, #tpu.memory_space<vmem>>, %arg7: memref<1x1x96xf32, #tpu.memory_space<vmem>>, %arg8: memref<1x32x32xbf16, #tpu.memory_space<vmem>>, %arg9: memref<1x1x32xf32, #tpu.memory_space<vmem>>, %arg10: memref<1x1x32xf32, #tpu.memory_space<vmem>>, %arg11: memref<1x1x32xf32, #tpu.memory_space<vmem>>, %arg12: memref<1x32x64xbf16, #tpu.memory_space<vmem>>, %arg13: memref<1x1x64xf32, #tpu.memory_space<vmem>>, %arg14: memref<1x64x32xbf16, #tpu.memory_space<vmem>>, %arg15: memref<1x1x32xf32, #tpu.memory_space<vmem>>, %arg16: memref<1x1x32xf32, #tpu.memory_space<vmem>>, %arg17: memref<1x1x32xf32, #tpu.memory_space<vmem>>, %arg18: memref<16x32xf32, #tpu.memory_space<vmem>>) attributes {dimension_semantics = [#tpu.dimension_semantics<parallel>, #tpu.dimension_semantics<arbitrary>], iteration_bounds = array<i64: 1, 2>, scalar_prefetch = 0 : i64, scratch_operands = 0 : i64, tpu.core_type = #tpu.core_type<tc>, window_params = [{transform_indices = @transform_0, window_bounds = array<i64: 16, 1>}, {transform_indices = @transform_1, window_bounds = array<i64: 1, 2, 1, 8>}, {pipeline_mode = #tpu.pipeline_mode<synchronous>, transform_indices = @transform_2, window_bounds = array<i64: 1, 32>}, {pipeline_mode = #tpu.pipeline_mode<synchronous>, transform_indices = @transform_3, window_bounds = array<i64: 1, 32>}, {transform_indices = @transform_4, window_bounds = array<i64: 1, 32, 96>}, {transform_indices = @transform_5, window_bounds = array<i64: 1, 1, 96>}, {transform_indices = @transform_6, window_bounds = array<i64: 1, 32, 32>}, {transform_indices = @transform_7, window_bounds = array<i64: 1, 1, 32>}, {transform_indices = @transform_8, window_bounds = array<i64: 1, 1, 32>}, {transform_indices = @transform_9, window_bounds = array<i64: 1, 1, 32>}, {transform_indices = @transform_10, window_bounds = array<i64: 1, 32, 64>}, {transform_indices = @transform_11, window_bounds = array<i64: 1, 1, 64>}, {transform_indices = @transform_12, window_bounds = array<i64: 1, 64, 32>}, {transform_indices = @transform_13, window_bounds = array<i64: 1, 1, 32>}, {transform_indices = @transform_14, window_bounds = array<i64: 1, 1, 32>}, {transform_indices = @transform_15, window_bounds = array<i64: 1, 1, 32>}, {transform_indices = @transform_16, window_bounds = array<i64: 16, 32>}]} {
    %c0_i32 = arith.constant 0 : i32
    %0 = arith.cmpi eq, %arg1, %c0_i32 : i32
    %1 = arith.extui %0 : i1 to i32
    %c0_i32_0 = arith.constant 0 : i32
    %2 = arith.cmpi ne, %1, %c0_i32_0 : i32
    scf.if %2 {
      %c0_74 = arith.constant 0 : index
      %c0_75 = arith.constant 0 : index
      %196 = vector.load %arg2[%c0_74, %c0_75] : memref<16x1xf32, #tpu.memory_space<vmem>>, vector<16x1xf32>
      %c0_76 = arith.constant 0 : index
      %c0_77 = arith.constant 0 : index
      %197 = vector.load %arg4[%c0_76, %c0_77] : memref<1x32xf32, #tpu.memory_space<vmem>>, vector<1x32xf32>
      %198 = vector.broadcast %196 : vector<16x1xf32> to vector<16x32xf32>
      %199 = vector.broadcast %197 : vector<1x32xf32> to vector<16x32xf32>
      %200 = arith.mulf %198, %199 : vector<16x32xf32>
      %c0_78 = arith.constant 0 : index
      %c0_79 = arith.constant 0 : index
      %201 = vector.load %arg5[%c0_78, %c0_79] : memref<1x32xf32, #tpu.memory_space<vmem>>, vector<1x32xf32>
      %202 = vector.broadcast %201 : vector<1x32xf32> to vector<16x32xf32>
      %203 = arith.addf %200, %202 : vector<16x32xf32>
      %c0_80 = arith.constant 0 : index
      %c0_81 = arith.constant 0 : index
      %204 = vector.load %arg18[%c0_80, %c0_81] : memref<16x32xf32, #tpu.memory_space<vmem>>, vector<16x32xf32>
      tpu.vector_store %arg18[%c0_80, %c0_81], %203 {strides = array<i32>} : memref<16x32xf32, #tpu.memory_space<vmem>>, vector<16x32xf32>,
    } else {
    }
    %c0 = arith.constant 0 : index
    %c0_1 = arith.constant 0 : index
    %3 = vector.load %arg18[%c0, %c0_1] : memref<16x32xf32, #tpu.memory_space<vmem>>, vector<16x32xf32>
    %4 = arith.truncf %3 : vector<16x32xf32> to vector<16x32xbf16>
    %c0_2 = arith.constant 0 : index
    %c0_3 = arith.constant 0 : index
    %c0_4 = arith.constant 0 : index
    %5 = vector.load %arg6[%c0_2, %c0_3, %c0_4] : memref<1x32x96xbf16, #tpu.memory_space<vmem>>, vector<1x32x96xbf16>
    %6 = vector.shape_cast %5 : vector<1x32x96xbf16> to vector<32x96xbf16>
    %cst = arith.constant dense<0.000000e+00> : vector<16x96xf32>
    %7 = tpu.matmul %4, %6, %cst {dimension_numbers = #tpu.dot_dimension_numbers<[1], [0], [0], [1], [0, 0, 1, 1], [], []>} : vector<16x32xbf16>, vector<32x96xbf16>, vector<16x96xf32> -> vector<16x96xf32>
    %c0_5 = arith.constant 0 : index
    %c0_6 = arith.constant 0 : index
    %c0_7 = arith.constant 0 : index
    %8 = vector.load %arg7[%c0_5, %c0_6, %c0_7] : memref<1x1x96xf32, #tpu.memory_space<vmem>>, vector<1x1x96xf32>
    %9 = vector.shape_cast %8 : vector<1x1x96xf32> to vector<1x96xf32>
    %10 = vector.broadcast %9 : vector<1x96xf32> to vector<16x96xf32>
    %11 = arith.addf %7, %10 : vector<16x96xf32>
    %c0_8 = arith.constant 0 : index
    %c0_9 = arith.constant 0 : index
    %c0_10 = arith.constant 0 : index
    %c0_11 = arith.constant 0 : index
    %12 = vector.load %arg3[%c0_8, %c0_9, %c0_10, %c0_11] : memref<1x2x1x8xf32, #tpu.memory_space<vmem>>, vector<1x2x1x8xf32>
    %13 = vector.shape_cast %12 : vector<1x2x1x8xf32> to vector<2x1x8xf32>
    %14 = vector.extract_strided_slice %11 {offsets = [0, 0], sizes = [16, 8], strides = [1, 1]} : vector<16x96xf32> to vector<16x8xf32>
    %15 = vector.shape_cast %14 : vector<16x8xf32> to vector<2x8x8xf32>
    %16 = arith.truncf %15 : vector<2x8x8xf32> to vector<2x8x8xbf16>
    %17 = vector.extract_strided_slice %11 {offsets = [0, 32], sizes = [16, 8], strides = [1, 1]} : vector<16x96xf32> to vector<16x8xf32>
    %18 = vector.shape_cast %17 : vector<16x8xf32> to vector<2x8x8xf32>
    %19 = arith.truncf %18 : vector<2x8x8xf32> to vector<2x8x8xbf16>
    %20 = vector.extract_strided_slice %11 {offsets = [0, 64], sizes = [16, 8], strides = [1, 1]} : vector<16x96xf32> to vector<16x8xf32>
    %21 = vector.shape_cast %20 : vector<16x8xf32> to vector<2x8x8xf32>
    %22 = arith.truncf %21 : vector<2x8x8xf32> to vector<2x8x8xbf16>
    "tpu.trace_start"() <{level = 10 : i32, message = "bqd,bkd->bqk"}> : () -> ()
    %cst_12 = arith.constant dense<0.000000e+00> : vector<2x8x8xf32>
    %23 = tpu.matmul %16, %19, %cst_12 {dimension_numbers = #tpu.dot_dimension_numbers<[2], [2], [1], [1], [0, 0, 0, 1, 1, 1], [0], [0]>} : vector<2x8x8xbf16>, vector<2x8x8xbf16>, vector<2x8x8xf32> -> vector<2x8x8xf32>
    "tpu.trace_stop"() : () -> ()
    %24 = vector.broadcast %13 : vector<2x1x8xf32> to vector<2x8x8xf32>
    %25 = arith.addf %23, %24 : vector<2x8x8xf32>
    %cst_13 = arith.constant dense<0xFF800000> : vector<2x8xf32>
    %26 = vector.multi_reduction <maximumf>, %25, %cst_13 [2] : vector<2x8x8xf32> to vector<2x8xf32>
    %27 = vector.shape_cast %26 : vector<2x8xf32> to vector<2x8x1xf32>
    %28 = vector.broadcast %27 : vector<2x8x1xf32> to vector<2x8x8xf32>
    %29 = arith.subf %25, %28 : vector<2x8x8xf32>
    %30 = math.exp %29 : vector<2x8x8xf32>
    %cst_14 = arith.constant dense<0.000000e+00> : vector<2x8xf32>
    %31 = vector.multi_reduction <add>, %30, %cst_14 [2] : vector<2x8x8xf32> to vector<2x8xf32>
    %32 = vector.shape_cast %31 : vector<2x8xf32> to vector<2x8x1xf32>
    %33 = tpu.reciprocal %32 {approx = true} : vector<2x8x1xf32> -> vector<2x8x1xf32>
    %34 = vector.broadcast %33 : vector<2x8x1xf32> to vector<2x8x8xf32>
    %35 = arith.mulf %30, %34 : vector<2x8x8xf32>
    %36 = arith.truncf %35 : vector<2x8x8xf32> to vector<2x8x8xbf16>
    "tpu.trace_start"() <{level = 10 : i32, message = "bqk,bkd->bqd"}> : () -> ()
    %cst_15 = arith.constant dense<0.000000e+00> : vector<2x8x8xf32>
    %37 = tpu.matmul %36, %22, %cst_15 {dimension_numbers = #tpu.dot_dimension_numbers<[2], [1], [1], [2], [0, 0, 0, 1, 1, 2], [0], [0]>} : vector<2x8x8xbf16>, vector<2x8x8xbf16>, vector<2x8x8xf32> -> vector<2x8x8xf32>
    "tpu.trace_stop"() : () -> ()
    %38 = vector.shape_cast %37 : vector<2x8x8xf32> to vector<16x8xf32>
    %39 = vector.extract_strided_slice %11 {offsets = [0, 8], sizes = [16, 8], strides = [1, 1]} : vector<16x96xf32> to vector<16x8xf32>
    %40 = vector.shape_cast %39 : vector<16x8xf32> to vector<2x8x8xf32>
    %41 = arith.truncf %40 : vector<2x8x8xf32> to vector<2x8x8xbf16>
    %42 = vector.extract_strided_slice %11 {offsets = [0, 40], sizes = [16, 8], strides = [1, 1]} : vector<16x96xf32> to vector<16x8xf32>
    %43 = vector.shape_cast %42 : vector<16x8xf32> to vector<2x8x8xf32>
    %44 = arith.truncf %43 : vector<2x8x8xf32> to vector<2x8x8xbf16>
    %45 = vector.extract_strided_slice %11 {offsets = [0, 72], sizes = [16, 8], strides = [1, 1]} : vector<16x96xf32> to vector<16x8xf32>
    %46 = vector.shape_cast %45 : vector<16x8xf32> to vector<2x8x8xf32>
    %47 = arith.truncf %46 : vector<2x8x8xf32> to vector<2x8x8xbf16>
    "tpu.trace_start"() <{level = 10 : i32, message = "bqd,bkd->bqk"}> : () -> ()
    %cst_16 = arith.constant dense<0.000000e+00> : vector<2x8x8xf32>
    %48 = tpu.matmul %41, %44, %cst_16 {dimension_numbers = #tpu.dot_dimension_numbers<[2], [2], [1], [1], [0, 0, 0, 1, 1, 1], [0], [0]>} : vector<2x8x8xbf16>, vector<2x8x8xbf16>, vector<2x8x8xf32> -> vector<2x8x8xf32>
    "tpu.trace_stop"() : () -> ()
    %49 = vector.broadcast %13 : vector<2x1x8xf32> to vector<2x8x8xf32>
    %50 = arith.addf %48, %49 : vector<2x8x8xf32>
    %cst_17 = arith.constant dense<0xFF800000> : vector<2x8xf32>
    %51 = vector.multi_reduction <maximumf>, %50, %cst_17 [2] : vector<2x8x8xf32> to vector<2x8xf32>
    %52 = vector.shape_cast %51 : vector<2x8xf32> to vector<2x8x1xf32>
    %53 = vector.broadcast %52 : vector<2x8x1xf32> to vector<2x8x8xf32>
    %54 = arith.subf %50, %53 : vector<2x8x8xf32>
    %55 = math.exp %54 : vector<2x8x8xf32>
    %cst_18 = arith.constant dense<0.000000e+00> : vector<2x8xf32>
    %56 = vector.multi_reduction <add>, %55, %cst_18 [2] : vector<2x8x8xf32> to vector<2x8xf32>
    %57 = vector.shape_cast %56 : vector<2x8xf32> to vector<2x8x1xf32>
    %58 = tpu.reciprocal %57 {approx = true} : vector<2x8x1xf32> -> vector<2x8x1xf32>
    %59 = vector.broadcast %58 : vector<2x8x1xf32> to vector<2x8x8xf32>
    %60 = arith.mulf %55, %59 : vector<2x8x8xf32>
    %61 = arith.truncf %60 : vector<2x8x8xf32> to vector<2x8x8xbf16>
    "tpu.trace_start"() <{level = 10 : i32, message = "bqk,bkd->bqd"}> : () -> ()
    %cst_19 = arith.constant dense<0.000000e+00> : vector<2x8x8xf32>
    %62 = tpu.matmul %61, %47, %cst_19 {dimension_numbers = #tpu.dot_dimension_numbers<[2], [1], [1], [2], [0, 0, 0, 1, 1, 2], [0], [0]>} : vector<2x8x8xbf16>, vector<2x8x8xbf16>, vector<2x8x8xf32> -> vector<2x8x8xf32>
    "tpu.trace_stop"() : () -> ()
    %63 = vector.shape_cast %62 : vector<2x8x8xf32> to vector<16x8xf32>
    %64 = vector.extract_strided_slice %11 {offsets = [0, 16], sizes = [16, 8], strides = [1, 1]} : vector<16x96xf32> to vector<16x8xf32>
    %65 = vector.shape_cast %64 : vector<16x8xf32> to vector<2x8x8xf32>
    %66 = arith.truncf %65 : vector<2x8x8xf32> to vector<2x8x8xbf16>
    %67 = vector.extract_strided_slice %11 {offsets = [0, 48], sizes = [16, 8], strides = [1, 1]} : vector<16x96xf32> to vector<16x8xf32>
    %68 = vector.shape_cast %67 : vector<16x8xf32> to vector<2x8x8xf32>
    %69 = arith.truncf %68 : vector<2x8x8xf32> to vector<2x8x8xbf16>
    %70 = vector.extract_strided_slice %11 {offsets = [0, 80], sizes = [16, 8], strides = [1, 1]} : vector<16x96xf32> to vector<16x8xf32>
    %71 = vector.shape_cast %70 : vector<16x8xf32> to vector<2x8x8xf32>
    %72 = arith.truncf %71 : vector<2x8x8xf32> to vector<2x8x8xbf16>
    "tpu.trace_start"() <{level = 10 : i32, message = "bqd,bkd->bqk"}> : () -> ()
    %cst_20 = arith.constant dense<0.000000e+00> : vector<2x8x8xf32>
    %73 = tpu.matmul %66, %69, %cst_20 {dimension_numbers = #tpu.dot_dimension_numbers<[2], [2], [1], [1], [0, 0, 0, 1, 1, 1], [0], [0]>} : vector<2x8x8xbf16>, vector<2x8x8xbf16>, vector<2x8x8xf32> -> vector<2x8x8xf32>
    "tpu.trace_stop"() : () -> ()
    %74 = vector.broadcast %13 : vector<2x1x8xf32> to vector<2x8x8xf32>
    %75 = arith.addf %73, %74 : vector<2x8x8xf32>
    %cst_21 = arith.constant dense<0xFF800000> : vector<2x8xf32>
    %76 = vector.multi_reduction <maximumf>, %75, %cst_21 [2] : vector<2x8x8xf32> to vector<2x8xf32>
    %77 = vector.shape_cast %76 : vector<2x8xf32> to vector<2x8x1xf32>
    %78 = vector.broadcast %77 : vector<2x8x1xf32> to vector<2x8x8xf32>
    %79 = arith.subf %75, %78 : vector<2x8x8xf32>
    %80 = math.exp %79 : vector<2x8x8xf32>
    %cst_22 = arith.constant dense<0.000000e+00> : vector<2x8xf32>
    %81 = vector.multi_reduction <add>, %80, %cst_22 [2] : vector<2x8x8xf32> to vector<2x8xf32>
    %82 = vector.shape_cast %81 : vector<2x8xf32> to vector<2x8x1xf32>
    %83 = tpu.reciprocal %82 {approx = true} : vector<2x8x1xf32> -> vector<2x8x1xf32>
    %84 = vector.broadcast %83 : vector<2x8x1xf32> to vector<2x8x8xf32>
    %85 = arith.mulf %80, %84 : vector<2x8x8xf32>
    %86 = arith.truncf %85 : vector<2x8x8xf32> to vector<2x8x8xbf16>
    "tpu.trace_start"() <{level = 10 : i32, message = "bqk,bkd->bqd"}> : () -> ()
    %cst_23 = arith.constant dense<0.000000e+00> : vector<2x8x8xf32>
    %87 = tpu.matmul %86, %72, %cst_23 {dimension_numbers = #tpu.dot_dimension_numbers<[2], [1], [1], [2], [0, 0, 0, 1, 1, 2], [0], [0]>} : vector<2x8x8xbf16>, vector<2x8x8xbf16>, vector<2x8x8xf32> -> vector<2x8x8xf32>
    "tpu.trace_stop"() : () -> ()
    %88 = vector.shape_cast %87 : vector<2x8x8xf32> to vector<16x8xf32>
    %89 = vector.extract_strided_slice %11 {offsets = [0, 24], sizes = [16, 8], strides = [1, 1]} : vector<16x96xf32> to vector<16x8xf32>
    %90 = vector.shape_cast %89 : vector<16x8xf32> to vector<2x8x8xf32>
    %91 = arith.truncf %90 : vector<2x8x8xf32> to vector<2x8x8xbf16>
    %92 = vector.extract_strided_slice %11 {offsets = [0, 56], sizes = [16, 8], strides = [1, 1]} : vector<16x96xf32> to vector<16x8xf32>
    %93 = vector.shape_cast %92 : vector<16x8xf32> to vector<2x8x8xf32>
    %94 = arith.truncf %93 : vector<2x8x8xf32> to vector<2x8x8xbf16>
    %95 = vector.extract_strided_slice %11 {offsets = [0, 88], sizes = [16, 8], strides = [1, 1]} : vector<16x96xf32> to vector<16x8xf32>
    %96 = vector.shape_cast %95 : vector<16x8xf32> to vector<2x8x8xf32>
    %97 = arith.truncf %96 : vector<2x8x8xf32> to vector<2x8x8xbf16>
    "tpu.trace_start"() <{level = 10 : i32, message = "bqd,bkd->bqk"}> : () -> ()
    %cst_24 = arith.constant dense<0.000000e+00> : vector<2x8x8xf32>
    %98 = tpu.matmul %91, %94, %cst_24 {dimension_numbers = #tpu.dot_dimension_numbers<[2], [2], [1], [1], [0, 0, 0, 1, 1, 1], [0], [0]>} : vector<2x8x8xbf16>, vector<2x8x8xbf16>, vector<2x8x8xf32> -> vector<2x8x8xf32>
    "tpu.trace_stop"() : () -> ()
    %99 = vector.broadcast %13 : vector<2x1x8xf32> to vector<2x8x8xf32>
    %100 = arith.addf %98, %99 : vector<2x8x8xf32>
    %cst_25 = arith.constant dense<0xFF800000> : vector<2x8xf32>
    %101 = vector.multi_reduction <maximumf>, %100, %cst_25 [2] : vector<2x8x8xf32> to vector<2x8xf32>
    %102 = vector.shape_cast %101 : vector<2x8xf32> to vector<2x8x1xf32>
    %103 = vector.broadcast %102 : vector<2x8x1xf32> to vector<2x8x8xf32>
    %104 = arith.subf %100, %103 : vector<2x8x8xf32>
    %105 = math.exp %104 : vector<2x8x8xf32>
    %cst_26 = arith.constant dense<0.000000e+00> : vector<2x8xf32>
    %106 = vector.multi_reduction <add>, %105, %cst_26 [2] : vector<2x8x8xf32> to vector<2x8xf32>
    %107 = vector.shape_cast %106 : vector<2x8xf32> to vector<2x8x1xf32>
    %108 = tpu.reciprocal %107 {approx = true} : vector<2x8x1xf32> -> vector<2x8x1xf32>
    %109 = vector.broadcast %108 : vector<2x8x1xf32> to vector<2x8x8xf32>
    %110 = arith.mulf %105, %109 : vector<2x8x8xf32>
    %111 = arith.truncf %110 : vector<2x8x8xf32> to vector<2x8x8xbf16>
    "tpu.trace_start"() <{level = 10 : i32, message = "bqk,bkd->bqd"}> : () -> ()
    %cst_27 = arith.constant dense<0.000000e+00> : vector<2x8x8xf32>
    %112 = tpu.matmul %111, %97, %cst_27 {dimension_numbers = #tpu.dot_dimension_numbers<[2], [1], [1], [2], [0, 0, 0, 1, 1, 2], [0], [0]>} : vector<2x8x8xbf16>, vector<2x8x8xbf16>, vector<2x8x8xf32> -> vector<2x8x8xf32>
    "tpu.trace_stop"() : () -> ()
    %113 = vector.shape_cast %112 : vector<2x8x8xf32> to vector<16x8xf32>
    %114 = tpu.concatenate %38, %63, %88, %113 in 1 : vector<16x8xf32>, vector<16x8xf32>, vector<16x8xf32>, vector<16x8xf32> -> vector<16x32xf32>
    %115 = arith.truncf %114 : vector<16x32xf32> to vector<16x32xbf16>
    %c0_28 = arith.constant 0 : index
    %c0_29 = arith.constant 0 : index
    %c0_30 = arith.constant 0 : index
    %116 = vector.load %arg8[%c0_28, %c0_29, %c0_30] : memref<1x32x32xbf16, #tpu.memory_space<vmem>>, vector<1x32x32xbf16>
    %117 = vector.shape_cast %116 : vector<1x32x32xbf16> to vector<32x32xbf16>
    %cst_31 = arith.constant dense<0.000000e+00> : vector<16x32xf32>
    %118 = tpu.matmul %115, %117, %cst_31 {dimension_numbers = #tpu.dot_dimension_numbers<[1], [0], [0], [1], [0, 0, 1, 1], [], []>} : vector<16x32xbf16>, vector<32x32xbf16>, vector<16x32xf32> -> vector<16x32xf32>
    %c0_32 = arith.constant 0 : index
    %c0_33 = arith.constant 0 : index
    %c0_34 = arith.constant 0 : index
    %119 = vector.load %arg9[%c0_32, %c0_33, %c0_34] : memref<1x1x32xf32, #tpu.memory_space<vmem>>, vector<1x1x32xf32>
    %120 = vector.shape_cast %119 : vector<1x1x32xf32> to vector<1x32xf32>
    %121 = vector.broadcast %120 : vector<1x32xf32> to vector<16x32xf32>
    %122 = arith.addf %118, %121 : vector<16x32xf32>
    %123 = arith.addf %3, %122 : vector<16x32xf32>
    %c0_35 = arith.constant 0 : index
    %c0_36 = arith.constant 0 : index
    %c0_37 = arith.constant 0 : index
    %124 = vector.load %arg10[%c0_35, %c0_36, %c0_37] : memref<1x1x32xf32, #tpu.memory_space<vmem>>, vector<1x1x32xf32>
    %125 = vector.shape_cast %124 : vector<1x1x32xf32> to vector<1x32xf32>
    %c0_38 = arith.constant 0 : index
    %c0_39 = arith.constant 0 : index
    %c0_40 = arith.constant 0 : index
    %126 = vector.load %arg11[%c0_38, %c0_39, %c0_40] : memref<1x1x32xf32, #tpu.memory_space<vmem>>, vector<1x1x32xf32>
    %127 = vector.shape_cast %126 : vector<1x1x32xf32> to vector<1x32xf32>
    %cst_41 = arith.constant dense<0.000000e+00> : vector<16xf32>
    %128 = vector.multi_reduction <add>, %123, %cst_41 [1] : vector<16x32xf32> to vector<16xf32>
    %129 = vector.shape_cast %128 : vector<16xf32> to vector<16x1xf32>
    %cst_42 = arith.constant 3.200000e+01 : f32
    %130 = vector.broadcast %cst_42 : f32 to vector<16x1xf32>
    %131 = arith.divf %129, %130 : vector<16x1xf32>
    %132 = vector.broadcast %131 : vector<16x1xf32> to vector<16x32xf32>
    %133 = arith.subf %123, %132 : vector<16x32xf32>
    %134 = arith.mulf %133, %133 : vector<16x32xf32>
    %cst_43 = arith.constant dense<0.000000e+00> : vector<16xf32>
    %135 = vector.multi_reduction <add>, %134, %cst_43 [1] : vector<16x32xf32> to vector<16xf32>
    %136 = vector.shape_cast %135 : vector<16xf32> to vector<16x1xf32>
    %cst_44 = arith.constant 3.200000e+01 : f32
    %137 = vector.broadcast %cst_44 : f32 to vector<16x1xf32>
    %138 = arith.divf %136, %137 : vector<16x1xf32>
    %139 = vector.broadcast %131 : vector<16x1xf32> to vector<16x32xf32>
    %140 = arith.subf %123, %139 : vector<16x32xf32>
    %cst_45 = arith.constant 9.99999974E-6 : f32
    %141 = vector.broadcast %cst_45 : f32 to vector<16x1xf32>
    %142 = arith.addf %138, %141 : vector<16x1xf32>
    %143 = math.rsqrt %142 : vector<16x1xf32>
    %144 = vector.broadcast %143 : vector<16x1xf32> to vector<16x32xf32>
    %145 = arith.mulf %140, %144 : vector<16x32xf32>
    %146 = vector.broadcast %125 : vector<1x32xf32> to vector<16x32xf32>
    %147 = arith.mulf %145, %146 : vector<16x32xf32>
    %148 = vector.broadcast %127 : vector<1x32xf32> to vector<16x32xf32>
    %149 = arith.addf %147, %148 : vector<16x32xf32>
    %150 = arith.truncf %149 : vector<16x32xf32> to vector<16x32xbf16>
    %c0_46 = arith.constant 0 : index
    %c0_47 = arith.constant 0 : index
    %c0_48 = arith.constant 0 : index
    %151 = vector.load %arg12[%c0_46, %c0_47, %c0_48] : memref<1x32x64xbf16, #tpu.memory_space<vmem>>, vector<1x32x64xbf16>
    %152 = vector.shape_cast %151 : vector<1x32x64xbf16> to vector<32x64xbf16>
    %cst_49 = arith.constant dense<0.000000e+00> : vector<16x64xf32>
    %153 = tpu.matmul %150, %152, %cst_49 {dimension_numbers = #tpu.dot_dimension_numbers<[1], [0], [0], [1], [0, 0, 1, 1], [], []>} : vector<16x32xbf16>, vector<32x64xbf16>, vector<16x64xf32> -> vector<16x64xf32>
    %c0_50 = arith.constant 0 : index
    %c0_51 = arith.constant 0 : index
    %c0_52 = arith.constant 0 : index
    %154 = vector.load %arg13[%c0_50, %c0_51, %c0_52] : memref<1x1x64xf32, #tpu.memory_space<vmem>>, vector<1x1x64xf32>
    %155 = vector.shape_cast %154 : vector<1x1x64xf32> to vector<1x64xf32>
    %156 = vector.broadcast %155 : vector<1x64xf32> to vector<16x64xf32>
    %157 = arith.addf %153, %156 : vector<16x64xf32>
    %cst_53 = arith.constant 0.000000e+00 : f32
    %158 = vector.broadcast %cst_53 : f32 to vector<16x64xf32>
    %159 = arith.maximumf %157, %158 : vector<16x64xf32>
    %160 = arith.truncf %159 : vector<16x64xf32> to vector<16x64xbf16>
    %c0_54 = arith.constant 0 : index
    %c0_55 = arith.constant 0 : index
    %c0_56 = arith.constant 0 : index
    %161 = vector.load %arg14[%c0_54, %c0_55, %c0_56] : memref<1x64x32xbf16, #tpu.memory_space<vmem>>, vector<1x64x32xbf16>
    %162 = vector.shape_cast %161 : vector<1x64x32xbf16> to vector<64x32xbf16>
    %cst_57 = arith.constant dense<0.000000e+00> : vector<16x32xf32>
    %163 = tpu.matmul %160, %162, %cst_57 {dimension_numbers = #tpu.dot_dimension_numbers<[1], [0], [0], [1], [0, 0, 1, 1], [], []>} : vector<16x64xbf16>, vector<64x32xbf16>, vector<16x32xf32> -> vector<16x32xf32>
    %c0_58 = arith.constant 0 : index
    %c0_59 = arith.constant 0 : index
    %c0_60 = arith.constant 0 : index
    %164 = vector.load %arg15[%c0_58, %c0_59, %c0_60] : memref<1x1x32xf32, #tpu.memory_space<vmem>>, vector<1x1x32xf32>
    %165 = vector.shape_cast %164 : vector<1x1x32xf32> to vector<1x32xf32>
    %166 = vector.broadcast %165 : vector<1x32xf32> to vector<16x32xf32>
    %167 = arith.addf %163, %166 : vector<16x32xf32>
    %168 = arith.addf %149, %167 : vector<16x32xf32>
    %c0_61 = arith.constant 0 : index
    %c0_62 = arith.constant 0 : index
    %c0_63 = arith.constant 0 : index
    %169 = vector.load %arg16[%c0_61, %c0_62, %c0_63] : memref<1x1x32xf32, #tpu.memory_space<vmem>>, vector<1x1x32xf32>
    %170 = vector.shape_cast %169 : vector<1x1x32xf32> to vector<1x32xf32>
    %c0_64 = arith.constant 0 : index
    %c0_65 = arith.constant 0 : index
    %c0_66 = arith.constant 0 : index
    %171 = vector.load %arg17[%c0_64, %c0_65, %c0_66] : memref<1x1x32xf32, #tpu.memory_space<vmem>>, vector<1x1x32xf32>
    %172 = vector.shape_cast %171 : vector<1x1x32xf32> to vector<1x32xf32>
    %cst_67 = arith.constant dense<0.000000e+00> : vector<16xf32>
    %173 = vector.multi_reduction <add>, %168, %cst_67 [1] : vector<16x32xf32> to vector<16xf32>
    %174 = vector.shape_cast %173 : vector<16xf32> to vector<16x1xf32>
    %cst_68 = arith.constant 3.200000e+01 : f32
    %175 = vector.broadcast %cst_68 : f32 to vector<16x1xf32>
    %176 = arith.divf %174, %175 : vector<16x1xf32>
    %177 = vector.broadcast %176 : vector<16x1xf32> to vector<16x32xf32>
    %178 = arith.subf %168, %177 : vector<16x32xf32>
    %179 = arith.mulf %178, %178 : vector<16x32xf32>
    %cst_69 = arith.constant dense<0.000000e+00> : vector<16xf32>
    %180 = vector.multi_reduction <add>, %179, %cst_69 [1] : vector<16x32xf32> to vector<16xf32>
    %181 = vector.shape_cast %180 : vector<16xf32> to vector<16x1xf32>
    %cst_70 = arith.constant 3.200000e+01 : f32
    %182 = vector.broadcast %cst_70 : f32 to vector<16x1xf32>
    %183 = arith.divf %181, %182 : vector<16x1xf32>
    %184 = vector.broadcast %176 : vector<16x1xf32> to vector<16x32xf32>
    %185 = arith.subf %168, %184 : vector<16x32xf32>
    %cst_71 = arith.constant 9.99999974E-6 : f32
    %186 = vector.broadcast %cst_71 : f32 to vector<16x1xf32>
    %187 = arith.addf %183, %186 : vector<16x1xf32>
    %188 = math.rsqrt %187 : vector<16x1xf32>
    %189 = vector.broadcast %188 : vector<16x1xf32> to vector<16x32xf32>
    %190 = arith.mulf %185, %189 : vector<16x32xf32>
    %191 = vector.broadcast %170 : vector<1x32xf32> to vector<16x32xf32>
    %192 = arith.mulf %190, %191 : vector<16x32xf32>
    %193 = vector.broadcast %172 : vector<1x32xf32> to vector<16x32xf32>
    %194 = arith.addf %192, %193 : vector<16x32xf32>
    %c0_72 = arith.constant 0 : index
    %c0_73 = arith.constant 0 : index
    %195 = vector.load %arg18[%c0_72, %c0_73] : memref<16x32xf32, #tpu.memory_space<vmem>>, vector<16x32xf32>
    tpu.vector_store %arg18[%c0_72, %c0_73], %194 {strides = array<i32>} : memref<16x32xf32, #tpu.memory_space<vmem>>, vector<16x32xf32>,
    return
  }
  func.func @transform_0(%arg0: i32, %arg1: i32) -> (i32, i32) {
    %c0_i32 = arith.constant 0 : i32
    %c0_i32_0 = arith.constant 0 : i32
    return %arg0, %c0_i32 : i32, i32
  }
  func.func @transform_1(%arg0: i32, %arg1: i32) -> (i32, i32, i32, i32) {
    %c0_i32 = arith.constant 0 : i32
    %c0_i32_0 = arith.constant 0 : i32
    %c0_i32_1 = arith.constant 0 : i32
    %c0_i32_2 = arith.constant 0 : i32
    return %arg0, %c0_i32, %c0_i32_0, %c0_i32_1 : i32, i32, i32, i32
  }
  func.func @transform_2(%arg0: i32, %arg1: i32) -> (i32, i32) {
    %c0_i32 = arith.constant 0 : i32
    %c0_i32_0 = arith.constant 0 : i32
    %c0_i32_1 = arith.constant 0 : i32
    return %c0_i32, %c0_i32_0 : i32, i32
  }
  func.func @transform_3(%arg0: i32, %arg1: i32) -> (i32, i32) {
    %c0_i32 = arith.constant 0 : i32
    %c0_i32_0 = arith.constant 0 : i32
    %c0_i32_1 = arith.constant 0 : i32
    return %c0_i32, %c0_i32_0 : i32, i32
  }
  func.func @transform_4(%arg0: i32, %arg1: i32) -> (i32, i32, i32) {
    %c0_i32 = arith.constant 0 : i32
    %c0_i32_0 = arith.constant 0 : i32
    %c0_i32_1 = arith.constant 0 : i32
    return %arg1, %c0_i32, %c0_i32_0 : i32, i32, i32
  }
  func.func @transform_5(%arg0: i32, %arg1: i32) -> (i32, i32, i32) {
    %c0_i32 = arith.constant 0 : i32
    %c0_i32_0 = arith.constant 0 : i32
    %c0_i32_1 = arith.constant 0 : i32
    return %arg1, %c0_i32, %c0_i32_0 : i32, i32, i32
  }
  func.func @transform_6(%arg0: i32, %arg1: i32) -> (i32, i32, i32) {
    %c0_i32 = arith.constant 0 : i32
    %c0_i32_0 = arith.constant 0 : i32
    %c0_i32_1 = arith.constant 0 : i32
    return %arg1, %c0_i32, %c0_i32_0 : i32, i32, i32
  }
  func.func @transform_7(%arg0: i32, %arg1: i32) -> (i32, i32, i32) {
    %c0_i32 = arith.constant 0 : i32
    %c0_i32_0 = arith.constant 0 : i32
    %c0_i32_1 = arith.constant 0 : i32
    return %arg1, %c0_i32, %c0_i32_0 : i32, i32, i32
  }
  func.func @transform_8(%arg0: i32, %arg1: i32) -> (i32, i32, i32) {
    %c0_i32 = arith.constant 0 : i32
    %c0_i32_0 = arith.constant 0 : i32
    %c0_i32_1 = arith.constant 0 : i32
    return %arg1, %c0_i32, %c0_i32_0 : i32, i32, i32
  }
  func.func @transform_9(%arg0: i32, %arg1: i32) -> (i32, i32, i32) {
    %c0_i32 = arith.constant 0 : i32
    %c0_i32_0 = arith.constant 0 : i32
    %c0_i32_1 = arith.constant 0 : i32
    return %arg1, %c0_i32, %c0_i32_0 : i32, i32, i32
  }
  func.func @transform_10(%arg0: i32, %arg1: i32) -> (i32, i32, i32) {
    %c0_i32 = arith.constant 0 : i32
    %c0_i32_0 = arith.constant 0 : i32
    %c0_i32_1 = arith.constant 0 : i32
    return %arg1, %c0_i32, %c0_i32_0 : i32, i32, i32
  }
  func.func @transform_11(%arg0: i32, %arg1: i32) -> (i32, i32, i32) {
    %c0_i32 = arith.constant 0 : i32
    %c0_i32_0 = arith.constant 0 : i32
    %c0_i32_1 = arith.constant 0 : i32
    return %arg1, %c0_i32, %c0_i32_0 : i32, i32, i32
  }
  func.func @transform_12(%arg0: i32, %arg1: i32) -> (i32, i32, i32) {
    %c0_i32 = arith.constant 0 : i32
    %c0_i32_0 = arith.constant 0 : i32
    %c0_i32_1 = arith.constant 0 : i32
    return %arg1, %c0_i32, %c0_i32_0 : i32, i32, i32
  }
  func.func @transform_13(%arg0: i32, %arg1: i32) -> (i32, i32, i32) {
    %c0_i32 = arith.constant 0 : i32
    %c0_i32_0 = arith.constant 0 : i32
    %c0_i32_1 = arith.constant 0 : i32
    return %arg1, %c0_i32, %c0_i32_0 : i32, i32, i32
  }
  func.func @transform_14(%arg0: i32, %arg1: i32) -> (i32, i32, i32) {
    %c0_i32 = arith.constant 0 : i32
    %c0_i32_0 = arith.constant 0 : i32
    %c0_i32_1 = arith.constant 0 : i32
    return %arg1, %c0_i32, %c0_i32_0 : i32, i32, i32
  }
  func.func @transform_15(%arg0: i32, %arg1: i32) -> (i32, i32, i32) {
    %c0_i32 = arith.constant 0 : i32
    %c0_i32_0 = arith.constant 0 : i32
    %c0_i32_1 = arith.constant 0 : i32
    return %arg1, %c0_i32, %c0_i32_0 : i32, i32, i32
  }
  func.func @transform_16(%arg0: i32, %arg1: i32) -> (i32, i32) {
    %c0_i32 = arith.constant 0 : i32
    %c0_i32_0 = arith.constant 0 : i32
    return %arg0, %c0_i32 : i32, i32
  }
}

</mosaic_0001>

<bundles_post_ra>
// kernel: tpu_custom_call.1
= control target key start
LH: loop header
LB: loop body
LE: loop exit
PB: predicated region body
PF: predicated region fallthrough
CT: control target
= control target key end

     0   :  { %s3662_s0 = inlined_call_operand.vmem [shape: f32[16,1], index: 0, kind: input, shape index: {}]   ;;  %s3663_s1 = inlined_call_operand.vmem [shape: f32[1,2,1,8], index: 1, kind: input, shape index: {}]   ;;  %s3664_s2 = inlined_call_operand.hbm [shape: f32[1,32], index: 2, kind: input, shape index: {}]   ;;  %s3665_s3 = inlined_call_operand.hbm [shape: f32[1,32], index: 3, kind: input, shape index: {}]   ;;  %s3666_s4 = inlined_call_operand.vmem [shape: bf16[2,32,96], index: 4, kind: input, shape index: {}]   ;;  %s3667_s5 = inlined_call_operand.vmem [shape: f32[2,1,96], index: 5, kind: input, shape index: {}]   ;;  %s3668_s6 = inlined_call_operand.vmem [shape: bf16[2,32,32], index: 6, kind: input, shape index: {}]   ;;  %s3669_s7 = inlined_call_operand.vmem [shape: f32[2,1,32], index: 7, kind: input, shape index: {}]   ;;  %s3670_s8 = inlined_call_operand.hbm [shape: f32[2,1,32], index: 8, kind: input, shape index: {}]   ;;  %s3671_s9 = inlined_call_operand.hbm [shape: f32[2,1,32], index: 9, kind: input, shape index: {}]   ;;  %s3672_s10 = inlined_call_operand.vmem [shape: bf16[2,32,64], index: 10, kind: input, shape index: {}]   ;;  %s3673_s11 = inlined_call_operand.hbm [shape: f32[2,1,64], index: 11, kind: input, shape index: {}]   ;;  %s3674_s12 = inlined_call_operand.vmem [shape: bf16[2,64,32], index: 12, kind: input, shape index: {}]   ;;  %s3675_s13 = inlined_call_operand.vmem [shape: f32[2,1,32], index: 13, kind: input, shape index: {}]   ;;  %s3676_s14 = inlined_call_operand.vmem [shape: f32[2,1,32], index: 14, kind: input, shape index: {}]   ;;  %s3677_s15 = inlined_call_operand.vmem [shape: f32[2,1,32], index: 15, kind: input, shape index: {}]   ;;  %s3678_s16 = inlined_call_operand.hbm [shape: f32[16,32], index: 16, kind: output, shape index: {}]  }
   0x1   :  { %3685 = sst [smem:[#allocation19_spill]] %s3662_s0 }
   0x2   :  { %3686 = sst [smem:[#allocation20_spill]] %s3663_s1 }
   0x3   :  { %3687 = sst [smem:[#allocation21_spill]] %s3664_s2 }
   0x4   :  { %3688 = sst [smem:[#allocation22_spill]] %s3665_s3 }
   0x5   :  { %3689 = sst [smem:[#allocation23_spill]] %s3666_s4 }
   0x6   :  { %3690 = sst [smem:[#allocation24_spill]] %s3668_s6 }
   0x7   :  { %3691 = sst [smem:[#allocation25_spill]] %s3670_s8 }
   0x8   :  { %3692 = sst [smem:[#allocation26_spill]] %s3671_s9 }
   0x9   :  { %3693 = sst [smem:[#allocation27_spill]] %s3673_s11 }
   0xa   :  { %3694 = sst [smem:[#allocation28_spill]] %s3674_s12 }
   0xb   :  { %3695 = sst [smem:[#allocation29_spill]] %s3675_s13 }
   0xc   :  { %3696 = sst [smem:[#allocation30_spill]] %s3676_s14 }
   0xd   :  { %3697 = sst [smem:[#allocation31_spill]] %s3677_s15 }
   0xe   :  { %3698 = sst [smem:[#allocation32_spill]] %s3678_s16 }
   0xf   :  { %21 = vsyncpa [#allocation3], 0 }
  0x10   :  { %22 = vsyncpa [#allocation6], 0 }
  0x11   :  { %23 = vsyncpa [#allocation4], 0  ;;  %s3175_s21 = smov 0   ;;  %s3177_s22 = smov 0  }
  0x12   :  { %s3179_s23 = smov 0   ;;  %s3181_s24 = smov 0  }
  0x13   :  { %s3183_s25 = smov 0   ;;  %s3185_s26 = smov 0  }
  0x14 LB: > { %3699 = sst [smem:[#allocation15_spill]] %s3060_s25  ;;  %s3204_s27 = sadd.s32 4294967295, %s3064_s26   ;;  %s3064_s26 = sphi %s3185_s26, %s29_s26   ;;  %s3060_s25 = sphi %s3183_s25, %s3737_s25   ;;  %s3056_s24 = sphi %s3181_s24, %s3736_s24   ;;  %s3052_s23 = sphi %s3179_s23, %s3740_s23   ;;  %s3048_s22 = sphi %s3177_s22, %s3739_s22   ;;  %s3044_s21 = sphi %s3175_s21, %s3738_s21  }
  0x15   : > { %3700 = sst [smem:[#allocation16_spill]] %s3064_s26  ;;  %p253_p0 = scmp.ne.s32.totalorder %s3052_s23, %s3048_s22 }
  0x16   : > { %p259_p1 = scmp.ne.s32.totalorder %s3048_s22, %s3044_s21  ;;  %p3680_p2 = scmp.eq.s32.totalorder %s3204_s27, 0 }
  0x17   : > { %p2416_p3 = scmp.ge.s32.totalorder %s3064_s26, 1  ;;  %p478_p4 = scmp.lt.s32.totalorder %s3064_s26, 3 }
  0x18   : > { %p3214_p5 = por %p3680_p2, %p259_p1  ;;  %s3066_s30 = smov [#allocation2]  }
  0x19   : > { %p3218_p6 = pnand %p2416_p3, %p478_p4  ;;  %s507_s0 = sshll.u32 %s3066_s30, 4  ;;  %s508_s0 = int_to_ptr.vmem [resolvable:$true] %s507_s0 }
  0x1a   : > { %s246_s17 = sadd.s32 1, %s3052_s23  ;;  %s38_s19 = sadd.s32 1, %s3060_s25 }
  0x1b   : > { %p2683_p7 = pneg %p3218_p6  ;;  %p254_p9 = scmp.eq.s32.totalorder %s3064_s26, 0 }
  0x1c   : > { %p39_p10 = scmp.ge.s32.totalorder %s38_s19, 2  ;;  %s2853_s20 = scalar_lea.vmem %s508_s0, 16 }
  0x1d   : > { %p3227_p8 = pnand %p2683_p7, %p3680_p2  ;;  %p2854_p12 = scmp.ne.s32.totalorder %s508_s0, %s2853_s20 }
  0x1e   : > { %s2860_s21 = scalar_lea.vmem %s508_s0, 32  ;;  %p2861_p3 = scmp.lt.s32.totalorder %s508_s0, %s508_s0 }
  0x1f   : > { %p2844_p11 = pneg %p3227_p8  ;;  %p2862_p4 = scmp.lt.s32.totalorder %s2860_s21, %s2853_s20 }
  0x21   : > { %p2856_p13 = pnand %p2854_p12, %p2844_p11  ;;  %p2863_p7 = por %p2862_p4, %p2861_p3 }
  0x23   : > { %p2857_p1 = pneg %p2856_p13 }
  0x25   : > { %p2864_p2 = pnand %p2863_p7, %p2857_p1 }
  0x27   : > { %2867 = shalt.err (!%p2864_p2)
}
  0x28   : > { %s3704_s2 = sld [smem:[#allocation21_spill]]  ;;  %s3742_s19 = smov (%p39_p10, %s38_s19), 0 }
  0x29   : > { %3705 = sst [smem:[#allocation17_spill]] %s3742_s19  ;;  %p255_p2 = por %p254_p9, %p253_p0 }
  0x2a   : > { %p2702_p12 = scmp.lt.s32.totalorder %s3064_s26, 2  ;;  %s243_s20 = ssub.s32 %s3060_s25, %s3742_s19 }
  0x2b   : > { %s557_s21 = sand.u32 1, %s3064_s26   ;;  %p244_p13 = scmp.eq.s32.totalorder %s243_s20, 0 }
  0x2c   : > { %s3255_s16 = sand.u32 1, %s3052_s23   ;;  %s3258_s30 = sshll.u32 %s3060_s25, 4 }
  0x2d   : > { %s3261_s1 = scalar_select %p244_p13, %s3052_s23, %s246_s17  }
  0x2e   : > { %2686 = dma.hbm_to_vmem [thread:$0]  (!%p3227_p8), %s3704_s2, 16, %s508_s0, [#allocation3]  }
  0x2f   : > { %3706 = sst [smem:[#allocation18_spill]] %s3261_s1  ;;  %s560_s14 = scalar_lea.vmem [#allocation7], %s3255_s16 }
  0x30   : > { %s3707_s8 = sld [smem:[#allocation25_spill]]  ;;  %s567_s12 = sshll.u32 %s560_s14, 4  ;;  %s568_s12 = int_to_ptr.vmem [resolvable:$true] %s567_s12 }
  0x31   : > { %p3268_p0 = pnand %p2702_p12, %p255_p2  ;;  %s3709_s9 = sld [smem:[#allocation26_spill]] }
  0x32   : > { %s3276_s26 = scalar_lea.sflag [#allocation3], %s557_s21  ;;  %s2881_s17 = scalar_lea.vmem %s568_s12, 16 }
  0x33   : > { %p2870_p9 = pneg %p3268_p0  ;;  %p2882_p10 = scmp.ne.s32.totalorder %s568_s12, %s2881_s17 }
  0x34   : > { %s3067_s2 = smov [#allocation7]  }
  0x35   : > { %p2884_p1 = pnand %p2882_p10, %p2870_p9  ;;  %s2886_s14 = sshll.u32 %s3067_s2, 4  ;;  %s2887_s14 = int_to_ptr.vmem [resolvable:$false] %s2886_s14 }
  0x36   : > { %s565_s15 = scalar_lea.hbm %s3707_s8, %s3258_s30  ;;  %s2888_s0 = scalar_lea.vmem %s2887_s14, 32 }
  0x37   : > { %p2885_p3 = pneg %p2884_p1  ;;  %p2889_p4 = scmp.lt.s32.totalorder %s568_s12, %s2887_s14 }
  0x38   : > { %p2890_p7 = scmp.lt.s32.totalorder %s2888_s0, %s2881_s17 }
  0x3a   : > { %p2891_p2 = por %p2890_p7, %p2889_p4 }
  0x3c   : > { %p2892_p12 = pnand %p2891_p2, %p2885_p3 }
  0x3e   : > { %2895 = shalt.err (!%p2892_p12)
}
  0x3f   : > { %2693 = dma.hbm_to_vmem [thread:$0]  (!%p3268_p0), %s565_s15, 16, %s568_s12, %s3276_s26  }
  0x40   : > { %s577_s19 = scalar_lea.vmem [#allocation8], %s3255_s16  ;;  %s3068_s20 = smov [#allocation5]  }
  0x41   : > { %s584_s21 = sshll.u32 %s577_s19, 4  ;;  %s518_s25 = sshll.u32 %s3068_s20, 4  ;;  %s585_s21 = int_to_ptr.vmem [resolvable:$true] %s584_s21  ;;  %s519_s25 = int_to_ptr.vmem [resolvable:$true] %s518_s25 }
  0x42   : > { %s2909_s8 = scalar_lea.vmem %s585_s21, 16  ;;  %s3069_s17 = smov [#allocation8]  }
  0x43   : > { %p2910_p13 = scmp.ne.s32.totalorder %s585_s21, %s2909_s8  ;;  %s2914_s2 = sshll.u32 %s3069_s17, 4  ;;  %s2915_s2 = int_to_ptr.vmem [resolvable:$false] %s2914_s2 }
  0x44   : > { %s2916_s14 = scalar_lea.vmem %s2915_s2, 32  ;;  %p2917_p3 = scmp.lt.s32.totalorder %s585_s21, %s2915_s2 }
  0x45   : > { %p2912_p10 = pnand %p2910_p13, %p2870_p9  ;;  %p2918_p4 = scmp.lt.s32.totalorder %s2916_s14, %s2909_s8 }
  0x47   : > { %p2913_p1 = pneg %p2912_p10  ;;  %p2919_p7 = por %p2918_p4, %p2917_p3 }
  0x49   : > { %p2920_p2 = pnand %p2919_p7, %p2913_p1 }
  0x4b   : > { %2923 = shalt.err (!%p2920_p2)
}
  0x4c   : > { %s3710_s0 = scalar_lea.hbm %s3709_s9, %s3258_s30  ;;  %s2935_s19 = scalar_lea.vmem %s519_s25, 16 }
  0x4d   : > { %2696 = dma.hbm_to_vmem [thread:$0]  (!%p3268_p0), %s3710_s0, 16, %s585_s21, %s3276_s26  }
  0x4e   : > { %p2936_p12 = scmp.ne.s32.totalorder %s519_s25, %s2935_s19  ;;  %s2942_s8 = scalar_lea.vmem %s519_s25, 32 }
  0x4f   : > { %p2943_p1 = scmp.lt.s32.totalorder %s519_s25, %s519_s25  ;;  %p2944_p3 = scmp.lt.s32.totalorder %s2942_s8, %s2935_s19 }
  0x50   : > { %p2938_p13 = pnand %p2936_p12, %p2844_p11 }
  0x51   : > { %p2945_p4 = por %p2944_p3, %p2943_p1 }
  0x52   : > { %p2939_p10 = pneg %p2938_p13 }
  0x54   : > { %p2946_p7 = pnand %p2945_p4, %p2939_p10 }
  0x56   : > { %2949 = shalt.err (!%p2946_p7)
}
  0x57   : > { %s3711_s3 = sld [smem:[#allocation22_spill]]  ;;  %s602_s12 = scalar_lea.vmem [#allocation9], %s3255_s16 }
  0x58   : > { %s3712_s11 = sld [smem:[#allocation27_spill]]  ;;  %s609_s15 = sshll.u32 %s602_s12, 4  ;;  %s610_s15 = int_to_ptr.vmem [resolvable:$true] %s609_s15 }
  0x59   : > { %s2963_s0 = scalar_lea.vmem %s610_s15, 16  ;;  %s3070_s18 = smov [#allocation9]  }
  0x5a   : > { %p2964_p11 = scmp.ne.s32.totalorder %s610_s15, %s2963_s0  ;;  %s2968_s19 = sshll.u32 %s3070_s18, 4  ;;  %s2969_s19 = int_to_ptr.vmem [resolvable:$false] %s2968_s19 }
  0x5b   : > { %s2970_s8 = scalar_lea.vmem %s2969_s19, 32  ;;  %p2971_p13 = scmp.lt.s32.totalorder %s610_s15, %s2969_s19 }
  0x5c   : > { %p2966_p2 = pnand %p2964_p11, %p2870_p9  ;;  %p2972_p10 = scmp.lt.s32.totalorder %s2970_s8, %s2963_s0 }
  0x5d   : > { %2689 = dma.hbm_to_vmem [thread:$0]  (!%p3227_p8), %s3711_s3, 16, %s519_s25, [#allocation6]  }
  0x5e   : > { %s607_s14 = scalar_lea.hbm %s3712_s11, %s3258_s30  ;;  %p2967_p12 = pneg %p2966_p2 }
  0x5f   : > { %p2973_p8 = por %p2972_p10, %p2971_p13 }
  0x61   : > { %p2974_p1 = pnand %p2973_p8, %p2967_p12 }
  0x63   : > { %2977 = shalt.err (!%p2974_p1)
}
  0x64   : > { %2699 = dma.hbm_to_vmem [thread:$0]  (!%p3268_p0), %s607_s14, 16, %s610_s15, %s3276_s26  }
  0x65   : > { %644 = sbr.rel (%p3218_p6) target bundleno = 4203 (0x106b), region = 84  ;;  %p3713_p3 = scmp.eq.s32.totalorder (!%p3218_p6), %s3204_s27, 0 }
  0x6a   : > { %3027 = dma.done.wait (%p3713_p3), [#allocation3], 16   ;;  %p3714_p9 = pmov %p3713_p3 }
  0x6b   : > { %p3715_p4 = pmov %p3713_p3 }
  0x6c   : > { %3029 = vsyncadd (%p3714_p9), [#allocation3], 4294967280 }
  0x6d   : > { %3031 = dma.done.wait (%p3715_p4), [#allocation6], 16   ;;  %p3716_p7 = pmov %p3713_p3 }
  0x6e   : > { %s654_s13 = sand.u32 1, %s3204_s27   ;;  %s3329_s25 = sand.u32 1, %s3048_s22  }
  0x6f   : > { %3033 = vsyncadd (%p3716_p7), [#allocation6], 4294967280  ;;  %s655_s26 = scalar_lea.sflag [#allocation3], %s654_s13 }
  0x70   : > { %3035 = dma.done.wait (%p3214_p5), %s655_s26, 48  }
  0x71   : > { %3037 = vsyncadd (%p3214_p5), %s655_s26, 4294967248  ;;  %p778_p6 = scmp.lt.s32.totalorder %s3056_s24, 1  ;;  %s3717_s4 = sld [smem:[#allocation23_spill]] }
  0x72   : > { %s3718_s6 = sld [smem:[#allocation24_spill]]  ;;  %s673_s26 = scalar_lea.vmem [#allocation9], %s3329_s25 }
  0x73   : > { %s3338_s16 = scalar_select %p778_p6, %s3056_s24, 1 }
  0x74   : > { %s3720_s9 = sld [smem:[#allocation28_spill]]  ;;  %p2436_p5 = scmp.ne.s32.totalorder %s3056_s24, 0 }
  0x75   : > { %s2483_s30 = sshll.u32 %s3338_s16, 4  ;;  %s2486_s20 = sshll.u32 %s3338_s16, 5 }
  0x76   : > { %s3362_s29 = scalar_lea.vmem %s3672_s10, %s2483_s30  ;;  %s3721_s11 = sld [smem:[#allocation30_spill]] }
  0x77   : > { %s3348_s14 = scalar_lea.vmem %s3717_s4, %s2483_s30  ;;  %s3722_s1 = sld [smem:[#allocation31_spill]] }
  0x78   : > { %s3353_s0 = scalar_lea.vmem %s3718_s6, %s2483_s30  ;;  %s665_s30 = scalar_lea.vmem [#allocation8], %s3329_s25 }
  0x79   : > { %818 = sbr.rel (%p2436_p5) target bundleno = 261 (0x105), region = 108  ;;  %s3723_s21 = sld [smem:[#allocation19_spill]] (!%p2436_p5) }
  0x7a   : > { %s3372_s12 = scalar_lea.vmem %s3720_s9, %s2486_s20 }
  0x7c   : > { %s809_s18 = scalar_lea.vmem %s3721_s11, %s3338_s16 }
  0x7d   : > { %s812_s13 = scalar_lea.vmem %s3722_s1, %s3338_s16 }
  0x7e   : > { %v3071_v1 = vmov 0   ;;  %v2437_v3 = vld [vmem:[#allocation2] ss:$0 sm:$0xff]  ;;  %v2438_v4 = vld [vmem:[#allocation5] ss:$0 sm:$0xff]  ;;  %vm849_vm0 = vcmask 261120  }
  0x7f   : > { %s3724_s2 = smov %s3723_s21  ;;  %v819_v0 = vld [vmem:[%s3723_s21] sm:$0xff]  ;;  %2776 = vset.pattern.permute.xlu0 %v3071_v1 }
  0x80   : > { %824 = vperm.xlu0 %2776, %v819_v0   ;;  %v820_v2 = vld [vmem:[%s3724_s2 + $0x8] sm:$0xff] }
  0x84   : > { %829 = vperm.xlu0 %2776, %v820_v2  }
  0xfb   : > { %v825_v5 = vpop.permute.xlu0 %824 }
  0xfc   : > { %v838_v6 = vmul.f32 %v2437_v3, %v825_v5 }
  0xfe   : > { %v847_v7 = vadd.f32 %v2438_v4, %v838_v6 }
  0xff   : > { %v830_v8 = vpop.permute.xlu0 %829 }
 0x100   : > { %850 = vst.msk [vmem:[#allocation10] sm:$0xff] %vm849_vm0, %v847_v7  ;;  %v839_v9 = vmul.f32 %v2437_v3, %v830_v8 }
 0x102   : > { %v848_v10 = vadd.f32 %v2438_v4, %v839_v9 }
 0x104   : > { %851 = vst.msk [vmem:[#allocation10 + $0x8] sm:$0xff] %vm849_vm0, %v848_v10 }
 0x105 PF: > { %v2792_v11 = vld [vmem:[%s3348_s14 + $0x8] sm:$0xff]   ;;  %v3072_v12 = vmov 0.0   ;;  %v2793_v13 = vld [vmem:[%s3348_s14] sm:$0xff]   ;;  %vm3073_vm1 = vmmov 0   ;;  %vm878_vm2 = vcmask 261120   ;;  %s3725_s9 = scalar_lea.vmem %s3667_s5, %s3338_s16  ;;  %s3074_s11 = smov 96  }
 0x106   : > { %2533 = vmatprep.subr.bf16.mxu0 %v3072_v12  ;;  %2541 = vmatprep.subr.bf16.mxu1 %v3072_v12  ;;  %v2439_v17 = vld [vmem:[%s3725_s9] ss:$0 sm:$0xff]  ;;  %vm942_vm3 = vcmask 64512   ;;  %s3726_s8 = sld [smem:[#allocation20_spill]]  ;;  %s3075_s19 = smov 64   ;;  %vm1067_vm4 = vcmask 1043456  }
 0x107   : > { %2534 = vmatpush3.bf16.msra.mxu0 %v2792_v11  ;;  %2537 = vmatprep.mubr.msk.bf16.mxu0 %vm3073_vm1, %v3072_v12  ;;  %v3397_v14 = vld [vmem:[#allocation10] sm:$0xff]  ;;  %s3076_s28 = smov 88   ;;  %s3077_s17 = smov 120   ;;  %vm1845_vm5 = vcmask 130048   ;;  %vm1848_vm6 = vcmask 195584   ;;  %vm2076_vm7 = vcmask 523264  }
 0x108   : > { %2535 = vmatprep.subr.bf16.mxu0 %v3072_v12  ;;  %2543 = vmatprep.mubr.msk.bf16.mxu1 %vm3073_vm1, %v3072_v12  ;;  %s3078_s21 = smov 56   ;;  %s3079_s3 = smov 80  }
 0x109   : > { %s3080_s4 = smov 112   ;;  %s3081_s1 = smov 48  }
 0x10a   : > { %s3082_s6 = smov 72   ;;  %s3083_s9 = smov 104  }
 0x10b   : > { %v3399_v15 = vld [vmem:[#allocation10 + $0x8] sm:$0xff]  ;;  %2536 = vmatpush3.bf16.msra.mxu0 %v2793_v13  ;;  %s3085_s24 = smov 8   ;;  %s3086_s14 = smov 16  }
 0x10c   : > { %v854_v16 = vpack.c.bf16 %v3399_v15, %v3397_v14  ;;  %2547 = vmatprep.subr.bf16.mxu0 %v3072_v12  ;;  %v3436_v30 = vld [vmem:[%s3726_s8] ss:$0 sm:$0xff]  ;;  %v3442_v34 = vld [vmem:[%s3726_s8 + $0x1] ss:$0 sm:$0xff]  ;;  %s3087_s20 = smov 24   ;;  %p2705_p0 = scmp.eq.s32.totalorder %s3204_s27, 1 }
 0x10e   : > { %2538 = vmatmul.mubr.msk.bf16.vlgmr.msra.gmra.mxu0 %vm878_vm2, %v854_v16 }
 0x10f   : > { %2549 = vmatprep.mubr.msk.bf16.mxu0 %vm3073_vm1, %v3072_v12 }
 0x1ce   : > { %v916_v18 = vpop.f32.mrf.mxu0 }
 0x1cf   : > { %v917_v19 = vadd.f32 %v2439_v17, %v916_v18 }
 0x1d0   : > { %v2539_v20 = vpop.f32.mrf.mxu0 }
 0x1d1   : > { %v3415_v21 = vpack.c.bf16 %v917_v19, %v917_v19 }
 0x1d2   : > { %v919_v22 = vpop.f32.mrf.mxu0 }
 0x1d3   : > { %v920_v23 = vadd.f32 %v2439_v17, %v919_v22  ;;  %940 = vrot.lane.b32.xlu0 %v3415_v21, %s3074_s11 }
 0x1d4   : > { %v2540_v24 = vpop.f32.mrf.mxu0 }
 0x1d5   : > { %v3418_v25 = vpack.c.bf16 %v920_v23, %v920_v23 }
 0x1d7   : > { %990 = vrot.lane.b32.xlu0 %v3418_v25, %s3074_s11  ;;  %s3084_s11 = smov 40  }
 0x245   : > { %v941_v26 = vpop.permute.xlu0 %940 }
 0x246   : > { %v947_v27 = vsel %vm942_vm3, %v941_v26, 0 }
 0x247   : > { %2542 = vmatpush3.bf16.xpose.msra.mxu1 %v947_v27 }
 0x248   : > { %2553 = vmatprep.subr.bf16.mxu1 %v3072_v12 }
 0x249   : > { %v991_v28 = vpop.permute.xlu0 %990 }
 0x24a   : > { %v996_v29 = vsel %vm942_vm3, %v991_v28, 0 }
 0x24b   : > { %2548 = vmatpush3.bf16.xpose.msra.mxu0 %v996_v29 }
 0x24c   : > { %2559 = vmatprep.subr.bf16.mxu0 %v3072_v12 }
 0x24e   : > { %2544 = vmatmul.mubr.msk.bf16.vlgmr.msra.gmra.mxu1 %vm942_vm3, %v3415_v21 }
 0x24f   : > { %2555 = vmatprep.mubr.msk.bf16.mxu1 %vm3073_vm1, %v3072_v12 }
 0x252   : > { %2550 = vmatmul.mubr.msk.bf16.vlgmr.msra.gmra.mxu0 %vm942_vm3, %v3418_v25 }
 0x253   : > { %2561 = vmatprep.mubr.msk.bf16.mxu0 %vm3073_vm1, %v3072_v12 }
 0x30e   : > { %v983_v31 = vpop.f32.mrf.mxu1 }
 0x30f   : > { %v984_v32 = vadd.f32 %v3436_v30, %v983_v31 }
 0x310   : > { %v2545_v33 = vpop.f32.mrf.mxu1 }
 0x311   : > { %v1038_v35 = vsel %vm942_vm3, %v984_v32, -inf }
 0x312   : > { %1039 = vmax.xlane.f32.xlu1 %v1038_v35  ;;  %v986_v36 = vpop.f32.mrf.mxu1  ;;  %v1032_v37 = vpop.f32.mrf.mxu0 }
 0x313   : > { %v1033_v38 = vadd.f32 %v3442_v34, %v1032_v37 }
 0x314   : > { %v2546_v39 = vpop.f32.mrf.mxu1  ;;  %v2551_v40 = vpop.f32.mrf.mxu0 }
 0x315   : > { %v1041_v41 = vsel %vm942_vm3, %v1033_v38, -inf }
 0x316   : > { %1042 = vmax.xlane.f32.xlu1 %v1041_v41  ;;  %v1035_v42 = vpop.f32.mrf.mxu0 }
 0x318   : > { %v2552_v43 = vpop.f32.mrf.mxu0 }
 0x327   : > { %1062 = vrot.lane.b32.xlu1 %v3415_v21, %s3075_s19 }
 0x32b   : > { %1111 = vrot.lane.b32.xlu1 %v3418_v25, %s3075_s19  ;;  %s3727_s19 = scalar_lea.vmem %s3669_s7, %s3338_s16 }
 0x32f   : > { %1161 = vrot.lane.b32.xlu1 %v3415_v21, %s3076_s28 }
 0x39b   : > { %v1040_v44 = vpop.xlane.xlu1 %1039 }
 0x39c   : > { %v1044_v45 = vsub.f32 %v984_v32, %v1040_v44 }
 0x39e   : > { %v1046_v46 = vmul.f32 1.442695, %v1044_v45 }
 0x39f   : > { %v1043_v47 = vpop.xlane.xlu1 %1042 }
 0x3a0   : > { %2802 = vpow2.f32 %v1046_v46  ;;  %v1045_v48 = vsub.f32 %v1033_v38, %v1043_v47 }
 0x3a2   : > { %v1048_v49 = vmul.f32 1.442695, %v1045_v48 }
 0x3a3   : > { %v1063_v50 = vpop.permute.xlu1 %1062 }
 0x3a4   : > { %2804 = vpow2.f32 %v1048_v49  ;;  %v1069_v51 = vsel %vm1067_vm4, %v1063_v50, 0 }
 0x3a5   : > { %2554 = vmatpush3.bf16.msra.mxu1 %v1069_v51 }
 0x3a6   : > { %2565 = vmatprep.subr.bf16.mxu1 %v3072_v12 }
 0x3a7   : > { %v1112_v52 = vpop.permute.xlu1 %1111 }
 0x3a8   : > { %v1117_v53 = vsel %vm1067_vm4, %v1112_v52, 0 }
 0x3a9   : > { %2560 = vmatpush3.bf16.msra.mxu0 %v1117_v53 }
 0x3aa   : > { %2571 = vmatprep.subr.bf16.mxu0 %v3072_v12 }
 0x3ab   : > { %v1162_v58 = vpop.permute.xlu1 %1161 }
 0x3ac   : > { %v1167_v1 = vsel %vm942_vm3, %v1162_v58, 0 }
 0x3ad   : > { %v2803_v54 = vpop.eup %2802 }
 0x3ae   : > { %v1050_v55 = vsel %vm942_vm3, %v2803_v54, 0.0 }
 0x3af   : > { %1051 = vadd.xlane.f32.xlu0 %v1050_v55 }
 0x3b1   : > { %v2805_v56 = vpop.eup %2804 }
 0x3b2   : > { %v1053_v57 = vsel %vm942_vm3, %v2805_v56, 0.0 }
 0x3b3   : > { %1054 = vadd.xlane.f32.xlu1 %v1053_v57 }
 0x3c4   : > { %1211 = vrot.lane.b32.xlu1 %v3418_v25, %s3076_s28 }
 0x3c5   : > { %1159 = vrot.lane.b32.xlu0 %v3415_v21, %s3077_s17 }
 0x3c8   : > { %1209 = vrot.lane.b32.xlu1 %v3418_v25, %s3077_s17  ;;  %s3729_s17 = sld [smem:[#allocation29_spill]] }
 0x438   : > { %v1052_v59 = vpop.xlane.xlu0 %1051 }
 0x439   : > { %2806 = vrcp.f32 %v1052_v59 }
 0x43c   : > { %v1055_v60 = vpop.xlane.xlu1 %1054  ;;  %v1160_v6 = vpop.permute.xlu0 %1159 }
 0x43d   : > { %2808 = vrcp.f32 %v1055_v60 }
 0x440   : > { %v1212_v3 = vpop.permute.xlu1 %1211 }
 0x441   : > { %v1217_v5 = vsel %vm942_vm3, %v1212_v3, 0 }
 0x444   : > { %v1210_v7 = vpop.permute.xlu1 %1209 }
 0x446   : > { %v2807_v61 = vpop.eup %2806 }
 0x447   : > { %v1058_v62 = vmul.f32 %v2807_v61, %v2803_v54 }
 0x449   : > { %v1060_v63 = vpack.c.bf16 %v1058_v62, %v1058_v62 }
 0x44a   : > { %v2809_v0 = vpop.eup %2808 }
 0x44b   : > { %2556 = vmatmul.mubr.msk.bf16.vlgmr.msra.gmra.mxu1 %vm942_vm3, %v1060_v63  ;;  %v1059_v2 = vmul.f32 %v2809_v0, %v2805_v56 }
 0x44c   : > { %2566 = vmatpush3.bf16.xpose.msra.mxu1 %v1167_v1  ;;  %2567 = vmatprep.mubr.msk.bf16.mxu1 %vm3073_vm1, %v3072_v12 }
 0x44d   : > { %v1061_v4 = vpack.c.bf16 %v1059_v2, %v1059_v2  ;;  %2577 = vmatprep.subr.bf16.mxu1 %v3072_v12 }
 0x44f   : > { %2562 = vmatmul.mubr.msk.bf16.vlgmr.msra.gmra.mxu0 %vm942_vm3, %v1061_v4 }
 0x450   : > { %2572 = vmatpush3.bf16.xpose.msra.mxu0 %v1217_v5  ;;  %2573 = vmatprep.mubr.msk.bf16.mxu0 %vm3073_vm1, %v3072_v12 }
 0x451   : > { %2583 = vmatprep.subr.bf16.mxu0 %v3072_v12 }
 0x453   : > { %2568 = vmatmul.mubr.msk.bf16.vlgmr.msra.gmra.mxu1 %vm942_vm3, %v1160_v6 }
 0x454   : > { %2579 = vmatprep.mubr.msk.bf16.mxu1 %vm3073_vm1, %v3072_v12 }
 0x457   : > { %2574 = vmatmul.mubr.msk.bf16.vlgmr.msra.gmra.mxu0 %vm942_vm3, %v1210_v7 }
 0x458   : > { %2585 = vmatprep.mubr.msk.bf16.mxu0 %vm3073_vm1, %v3072_v12 }
 0x50b   : > { %v3475_v8 = vpop.f32.mrf.mxu1 }
 0x50d   : > { %v2557_v9 = vpop.f32.mrf.mxu1 }
 0x50f   : > { %v1108_v10 = vpop.f32.mrf.mxu1  ;;  %v3477_v11 = vpop.f32.mrf.mxu0 }
 0x511   : > { %v2558_v13 = vpop.f32.mrf.mxu1  ;;  %v2563_v16 = vpop.f32.mrf.mxu0 }
 0x513   : > { %v1156_v17 = vpop.f32.mrf.mxu0  ;;  %v1203_v18 = vpop.f32.mrf.mxu1 }
 0x514   : > { %v1204_v19 = vadd.f32 %v3436_v30, %v1203_v18 }
 0x515   : > { %v2564_v20 = vpop.f32.mrf.mxu0  ;;  %v2569_v22 = vpop.f32.mrf.mxu1 }
 0x516   : > { %v1259_v23 = vsel %vm942_vm3, %v1204_v19, -inf }
 0x517   : > { %1260 = vmax.xlane.f32.xlu1 %v1259_v23  ;;  %v1206_v24 = vpop.f32.mrf.mxu1  ;;  %v1253_v26 = vpop.f32.mrf.mxu0 }
 0x518   : > { %v1254_v27 = vadd.f32 %v3442_v34, %v1253_v26 }
 0x519   : > { %v2570_v28 = vpop.f32.mrf.mxu1  ;;  %v2575_v29 = vpop.f32.mrf.mxu0 }
 0x51a   : > { %v1262_v31 = vsel %vm942_vm3, %v1254_v27, -inf }
 0x51b   : > { %1263 = vmax.xlane.f32.xlu0 %v1262_v31  ;;  %v1256_v32 = vpop.f32.mrf.mxu0 }
 0x51d   : > { %v2576_v33 = vpop.f32.mrf.mxu0 }
 0x528   : > { %1283 = vrot.lane.b32.xlu1 %v3415_v21, %s3078_s21 }
 0x52c   : > { %1381 = vrot.lane.b32.xlu1 %v3415_v21, %s3079_s3 }
 0x531   : > { %1331 = vrot.lane.b32.xlu0 %v3418_v25, %s3078_s21  ;;  %s3730_s21 = scalar_lea.vmem %s3729_s17, %s3338_s16 }
 0x535   : > { %1379 = vrot.lane.b32.xlu0 %v3415_v21, %s3080_s4 }
 0x5a0   : > { %v1261_v35 = vpop.xlane.xlu1 %1260 }
 0x5a1   : > { %v1265_v36 = vsub.f32 %v1204_v19, %v1261_v35 }
 0x5a3   : > { %v1267_v37 = vmul.f32 1.442695, %v1265_v36 }
 0x5a4   : > { %v1284_v38 = vpop.permute.xlu1 %1283  ;;  %v1264_v39 = vpop.xlane.xlu0 %1263 }
 0x5a5   : > { %2810 = vpow2.f32 %v1267_v37  ;;  %v1289_v40 = vsel %vm1067_vm4, %v1284_v38, 0  ;;  %v1266_v41 = vsub.f32 %v1254_v27, %v1264_v39 }
 0x5a6   : > { %2578 = vmatpush3.bf16.msra.mxu1 %v1289_v40 }
 0x5a7   : > { %v1269_v42 = vmul.f32 1.442695, %v1266_v41  ;;  %2589 = vmatprep.subr.bf16.mxu1 %v3072_v12 }
 0x5a8   : > { %v1332_v43 = vpop.permute.xlu0 %1331  ;;  %v1382_v49 = vpop.permute.xlu1 %1381 }
 0x5a9   : > { %2812 = vpow2.f32 %v1269_v42  ;;  %v1337_v44 = vsel %vm1067_vm4, %v1332_v43, 0  ;;  %v1387_v56 = vsel %vm942_vm3, %v1382_v49, 0 }
 0x5aa   : > { %2584 = vmatpush3.bf16.msra.mxu0 %v1337_v44 }
 0x5ab   : > { %2595 = vmatprep.subr.bf16.mxu0 %v3072_v12 }
 0x5ac   : > { %v1380_v61 = vpop.permute.xlu0 %1379 }
 0x5b2   : > { %v2811_v45 = vpop.eup %2810 }
 0x5b3   : > { %v1271_v46 = vsel %vm942_vm3, %v2811_v45, 0.0 }
 0x5b4   : > { %1272 = vadd.xlane.f32.xlu1 %v1271_v46 }
 0x5b6   : > { %v2813_v47 = vpop.eup %2812 }
 0x5b7   : > { %v1274_v48 = vsel %vm942_vm3, %v2813_v47, 0.0 }
 0x5b8   : > { %1275 = vadd.xlane.f32.xlu1 %v1274_v48 }
 0x5c9   : > { %1431 = vrot.lane.b32.xlu1 %v3418_v25, %s3079_s3 }
 0x5cd   : > { %1429 = vrot.lane.b32.xlu1 %v3418_v25, %s3080_s4 }
 0x63d   : > { %v1273_v50 = vpop.xlane.xlu1 %1272 }
 0x63e   : > { %2814 = vrcp.f32 %v1273_v50 }
 0x641   : > { %v1276_v51 = vpop.xlane.xlu1 %1275 }
 0x642   : > { %2816 = vrcp.f32 %v1276_v51 }
 0x645   : > { %v1432_v58 = vpop.permute.xlu1 %1431 }
 0x646   : > { %v1437_v60 = vsel %vm942_vm3, %v1432_v58, 0 }
 0x649   : > { %v1430_v62 = vpop.permute.xlu1 %1429 }
 0x64b   : > { %v2815_v52 = vpop.eup %2814 }
 0x64c   : > { %v1279_v53 = vmul.f32 %v2815_v52, %v2811_v45 }
 0x64e   : > { %v1281_v54 = vpack.c.bf16 %v1279_v53, %v1279_v53 }
 0x64f   : > { %v2817_v55 = vpop.eup %2816 }
 0x650   : > { %2580 = vmatmul.mubr.msk.bf16.vlgmr.msra.gmra.mxu1 %vm942_vm3, %v1281_v54  ;;  %v1280_v57 = vmul.f32 %v2817_v55, %v2813_v47 }
 0x651   : > { %2590 = vmatpush3.bf16.xpose.msra.mxu1 %v1387_v56  ;;  %2591 = vmatprep.mubr.msk.bf16.mxu1 %vm3073_vm1, %v3072_v12 }
 0x652   : > { %v1282_v59 = vpack.c.bf16 %v1280_v57, %v1280_v57  ;;  %2601 = vmatprep.subr.bf16.mxu1 %v3072_v12 }
 0x654   : > { %2586 = vmatmul.mubr.msk.bf16.vlgmr.msra.gmra.mxu0 %vm942_vm3, %v1282_v59 }
 0x655   : > { %2596 = vmatpush3.bf16.xpose.msra.mxu0 %v1437_v60  ;;  %2597 = vmatprep.mubr.msk.bf16.mxu0 %vm3073_vm1, %v3072_v12 }
 0x656   : > { %2607 = vmatprep.subr.bf16.mxu0 %v3072_v12 }
 0x658   : > { %2592 = vmatmul.mubr.msk.bf16.vlgmr.msra.gmra.mxu1 %vm942_vm3, %v1380_v61 }
 0x659   : > { %2603 = vmatprep.mubr.msk.bf16.mxu1 %vm3073_vm1, %v3072_v12 }
 0x65c   : > { %2598 = vmatmul.mubr.msk.bf16.vlgmr.msra.gmra.mxu0 %vm942_vm3, %v1430_v62 }
 0x65d   : > { %2609 = vmatprep.mubr.msk.bf16.mxu0 %vm3073_vm1, %v3072_v12 }
 0x710   : > { %v3511_v63 = vpop.f32.mrf.mxu1 }
 0x712   : > { %v2581_v0 = vpop.f32.mrf.mxu1 }
 0x714   : > { %v1328_v1 = vpop.f32.mrf.mxu1  ;;  %v3513_v2 = vpop.f32.mrf.mxu0 }
 0x715   : > { %v2777_v3 = vpack.i.bf16 %v3513_v2, %v3511_v63 }
 0x716   : > { %v2582_v4 = vpop.f32.mrf.mxu1  ;;  %v2587_v5 = vpop.f32.mrf.mxu0 }
 0x718   : > { %v1376_v6 = vpop.f32.mrf.mxu0  ;;  %v1423_v7 = vpop.f32.mrf.mxu1 }
 0x719   : > { %v1424_v9 = vadd.f32 %v3436_v30, %v1423_v7 }
 0x71a   : > { %v2588_v10 = vpop.f32.mrf.mxu0  ;;  %v2593_v13 = vpop.f32.mrf.mxu1 }
 0x71b   : > { %v1479_v16 = vsel %vm942_vm3, %v1424_v9, -inf }
 0x71c   : > { %1480 = vmax.xlane.f32.xlu0 %v1479_v16  ;;  %v1426_v17 = vpop.f32.mrf.mxu1  ;;  %v1473_v18 = vpop.f32.mrf.mxu0 }
 0x71d   : > { %v1474_v19 = vadd.f32 %v3442_v34, %v1473_v18 }
 0x71e   : > { %v2594_v20 = vpop.f32.mrf.mxu1  ;;  %v2599_v22 = vpop.f32.mrf.mxu0 }
 0x71f   : > { %v1482_v23 = vsel %vm942_vm3, %v1474_v19, -inf }
 0x720   : > { %1483 = vmax.xlane.f32.xlu1 %v1482_v23  ;;  %v1476_v24 = vpop.f32.mrf.mxu0 }
 0x722   : > { %v2600_v26 = vpop.f32.mrf.mxu0 }
 0x731   : > { %1503 = vrot.lane.b32.xlu1 %v3415_v21, %s3081_s1 }
 0x735   : > { %1601 = vrot.lane.b32.xlu1 %v3415_v21, %s3082_s6 }
 0x739   : > { %1651 = vrot.lane.b32.xlu1 %v3418_v25, %s3082_s6  ;;  %s3088_s6 = smov [#allocation10]  }
 0x73d   : > { %1649 = vrot.lane.b32.xlu1 %v3418_v25, %s3083_s9 }
 0x7a5   : > { %v1481_v27 = vpop.xlane.xlu0 %1480 }
 0x7a6   : > { %v1485_v28 = vsub.f32 %v1424_v9, %v1481_v27 }
 0x7a8   : > { %v1487_v29 = vmul.f32 1.442695, %v1485_v28 }
 0x7a9   : > { %v1484_v31 = vpop.xlane.xlu1 %1483 }
 0x7aa   : > { %2818 = vpow2.f32 %v1487_v29  ;;  %v1486_v32 = vsub.f32 %v1474_v19, %v1484_v31 }
 0x7ac   : > { %v1489_v33 = vmul.f32 1.442695, %v1486_v32 }
 0x7ad   : > { %v1504_v35 = vpop.permute.xlu1 %1503 }
 0x7ae   : > { %2820 = vpow2.f32 %v1489_v33  ;;  %v1509_v36 = vsel %vm1067_vm4, %v1504_v35, 0 }
 0x7af   : > { %2602 = vmatpush3.bf16.msra.mxu1 %v1509_v36 }
 0x7b0   : > { %2613 = vmatprep.subr.bf16.mxu1 %v3072_v12 }
 0x7b1   : > { %v1602_v46 = vpop.permute.xlu1 %1601 }
 0x7b2   : > { %v1607_v50 = vsel %vm942_vm3, %v1602_v46, 0 }
 0x7b5   : > { %v1652_v52 = vpop.permute.xlu1 %1651 }
 0x7b6   : > { %v1657_v54 = vsel %vm942_vm3, %v1652_v52, 0 }
 0x7b7   : > { %v2819_v37 = vpop.eup %2818 }
 0x7b8   : > { %v1491_v38 = vsel %vm942_vm3, %v2819_v37, 0.0 }
 0x7b9   : > { %1492 = vadd.xlane.f32.xlu0 %v1491_v38  ;;  %v1650_v56 = vpop.permute.xlu1 %1649 }
 0x7bb   : > { %v2821_v39 = vpop.eup %2820 }
 0x7bc   : > { %v1494_v40 = vsel %vm942_vm3, %v2821_v39, 0.0 }
 0x7bd   : > { %1495 = vadd.xlane.f32.xlu0 %v1494_v40 }
 0x7d3   : > { %1551 = vrot.lane.b32.xlu0 %v3418_v25, %s3081_s1 }
 0x7d7   : > { %1599 = vrot.lane.b32.xlu0 %v3415_v21, %s3083_s9  ;;  %s2178_s9 = sshll.u32 %s3088_s6, 4  ;;  %s2179_s9 = int_to_ptr.vmem [resolvable:$true] %s2178_s9 }
 0x7d8   : > { %p2985_p13 = scmp.lt.s32.totalorder %s2179_s9, %s2179_s9 }
 0x842   : > { %v1493_v41 = vpop.xlane.xlu0 %1492 }
 0x843   : > { %2822 = vrcp.f32 %v1493_v41  ;;  %v2794_v41 = vld [vmem:[%s3353_s0 + $0x8] sm:$0xff]  }
 0x846   : > { %v1496_v42 = vpop.xlane.xlu0 %1495 }
 0x847   : > { %2824 = vrcp.f32 %v1496_v42  ;;  %v2795_v42 = vld [vmem:[%s3353_s0] sm:$0xff]  }
 0x84a   : > { %v1552_v43 = vpop.permute.xlu0 %1551 }
 0x84b   : > { %v1557_v44 = vsel %vm1067_vm4, %v1552_v43, 0 }
 0x84c   : > { %2608 = vmatpush3.bf16.msra.mxu0 %v1557_v44 }
 0x84d   : > { %2619 = vmatprep.subr.bf16.mxu0 %v3072_v12 }
 0x84e   : > { %v1600_v55 = vpop.permute.xlu0 %1599 }
 0x850   : > { %v2823_v45 = vpop.eup %2822 }
 0x851   : > { %v1499_v47 = vmul.f32 %v2823_v45, %v2819_v37 }
 0x853   : > { %v1501_v48 = vpack.c.bf16 %v1499_v47, %v1499_v47 }
 0x854   : > { %v2825_v49 = vpop.eup %2824 }
 0x855   : > { %2604 = vmatmul.mubr.msk.bf16.vlgmr.msra.gmra.mxu1 %vm942_vm3, %v1501_v48  ;;  %v1500_v51 = vmul.f32 %v2825_v49, %v2821_v39 }
 0x856   : > { %2614 = vmatpush3.bf16.xpose.msra.mxu1 %v1607_v50  ;;  %2615 = vmatprep.mubr.msk.bf16.mxu1 %vm3073_vm1, %v3072_v12 }
 0x857   : > { %v1502_v53 = vpack.c.bf16 %v1500_v51, %v1500_v51  ;;  %2625 = vmatprep.subr.bf16.mxu1 %v3072_v12 }
 0x859   : > { %2610 = vmatmul.mubr.msk.bf16.vlgmr.msra.gmra.mxu0 %vm942_vm3, %v1502_v53 }
 0x85a   : > { %2620 = vmatpush3.bf16.xpose.msra.mxu0 %v1657_v54  ;;  %2621 = vmatprep.mubr.msk.bf16.mxu0 %vm3073_vm1, %v3072_v12 }
 0x85b   : > { %2631 = vmatprep.subr.bf16.mxu0 %v3072_v12 }
 0x85d   : > { %2616 = vmatmul.mubr.msk.bf16.vlgmr.msra.gmra.mxu1 %vm942_vm3, %v1600_v55 }
 0x85e   : > { %2627 = vmatprep.mubr.msk.bf16.mxu1 %vm3073_vm1, %v3072_v12 }
 0x861   : > { %2622 = vmatmul.mubr.msk.bf16.vlgmr.msra.gmra.mxu0 %vm942_vm3, %v1650_v56 }
 0x862   : > { %2633 = vmatprep.mubr.msk.bf16.mxu0 %vm3073_vm1, %v3072_v12 }
 0x915   : > { %v1545_v57 = vpop.f32.mrf.mxu1 }
 0x917   : > { %v2605_v58 = vpop.f32.mrf.mxu1 }
 0x919   : > { %v1548_v59 = vpop.f32.mrf.mxu1  ;;  %v1593_v60 = vpop.f32.mrf.mxu0 }
 0x91b   : > { %v2606_v61 = vpop.f32.mrf.mxu1  ;;  %v2611_v62 = vpop.f32.mrf.mxu0 }
 0x91d   : > { %v1596_v0 = vpop.f32.mrf.mxu0  ;;  %v1643_v1 = vpop.f32.mrf.mxu1 }
 0x91e   : > { %v1644_v4 = vadd.f32 %v3436_v30, %v1643_v1  ;;  %v2782_v30 = vpack.i.bf16 %v1593_v60, %v1545_v57 }
 0x91f   : > { %v2612_v5 = vpop.f32.mrf.mxu0  ;;  %v2617_v6 = vpop.f32.mrf.mxu1 }
 0x920   : > { %v1699_v7 = vsel %vm942_vm3, %v1644_v4, -inf }
 0x921   : > { %1700 = vmax.xlane.f32.xlu0 %v1699_v7  ;;  %v1646_v9 = vpop.f32.mrf.mxu1  ;;  %v1693_v10 = vpop.f32.mrf.mxu0 }
 0x922   : > { %v1694_v13 = vadd.f32 %v3442_v34, %v1693_v10 }
 0x923   : > { %v2618_v16 = vpop.f32.mrf.mxu1  ;;  %v2623_v17 = vpop.f32.mrf.mxu0 }
 0x924   : > { %v1702_v18 = vsel %vm942_vm3, %v1694_v13, -inf }
 0x925   : > { %1703 = vmax.xlane.f32.xlu1 %v1702_v18  ;;  %v1696_v19 = vpop.f32.mrf.mxu0 }
 0x927   : > { %v2624_v20 = vpop.f32.mrf.mxu0 }
 0x936   : > { %1723 = vrot.lane.b32.xlu1 %v3415_v21, %s3084_s11 }
 0x93a   : > { %2778 = vrot.lane.b32.xlu1 %v2777_v3, %s3085_s24 }
 0x93e   : > { %2783 = vrot.lane.b32.xlu1 %v2782_v30, %s3086_s14 }
 0x9aa   : > { %v1701_v34 = vpop.xlane.xlu0 %1700 }
 0x9ab   : > { %v1705_v22 = vsub.f32 %v1644_v4, %v1701_v34 }
 0x9ad   : > { %v1707_v23 = vmul.f32 1.442695, %v1705_v22 }
 0x9ae   : > { %v1704_v24 = vpop.xlane.xlu1 %1703 }
 0x9af   : > { %2826 = vpow2.f32 %v1707_v23  ;;  %v1706_v26 = vsub.f32 %v1694_v13, %v1704_v24 }
 0x9b1   : > { %v1709_v27 = vmul.f32 1.442695, %v1706_v26 }
 0x9b2   : > { %v1724_v28 = vpop.permute.xlu1 %1723 }
 0x9b3   : > { %2828 = vpow2.f32 %v1709_v27  ;;  %v1729_v21 = vsel %vm1067_vm4, %v1724_v28, 0 }
 0x9b4   : > { %2626 = vmatpush3.bf16.msra.mxu1 %v1729_v21 }
 0x9b5   : > { %2637 = vmatprep.subr.bf16.mxu1 %v3072_v12 }
 0x9b6   : > { %v2779_v52 = vpop.permute.xlu1 %2778 }
 0x9b7   : > { %v2781_v54 = vunpack.i.h.bf16 %v2779_v52  ;;  %v2780_v55 = vunpack.i.l.bf16 %v2779_v52 }
 0x9b9   : > { %v1844_v59 = vsel %vm942_vm3, %v3477_v11, %v2781_v54  ;;  %v1843_v60 = vsel %vm942_vm3, %v3475_v8, %v2780_v55  ;;  %v2461_v11 = vld [vmem:[%s3727_s19] ss:$0 sm:$0xff] }
 0x9ba   : > { %v2784_v53 = vpop.permute.xlu1 %2783 }
 0x9bb   : > { %v2786_v56 = vunpack.i.h.bf16 %v2784_v53  ;;  %v2785_v57 = vunpack.i.l.bf16 %v2784_v53 }
 0x9bc   : > { %v2827_v29 = vpop.eup %2826 }
 0x9bd   : > { %v1711_v63 = vsel %vm942_vm3, %v2827_v29, 0.0  ;;  %v1846_v0 = vsel %vm1845_vm5, %v1843_v60, %v2785_v57  ;;  %v1847_v1 = vsel %vm1845_vm5, %v1844_v59, %v2786_v56 }
 0x9be   : > { %1712 = vadd.xlane.f32.xlu0 %v1711_v63  ;;  %v2798_v63 = vld [vmem:[%s3372_s12 + $0x18] sm:$0xff]  }
 0x9c0   : > { %v2829_v2 = vpop.eup %2828 }
 0x9c1   : > { %v1714_v3 = vsel %vm942_vm3, %v2829_v2, 0.0 }
 0x9c2   : > { %1715 = vadd.xlane.f32.xlu0 %v1714_v3 }
 0x9d8   : > { %1771 = vrot.lane.b32.xlu0 %v3418_v25, %s3084_s11 }
 0xa47   : > { %v1713_v31 = vpop.xlane.xlu0 %1712 }
 0xa48   : > { %2830 = vrcp.f32 %v1713_v31 }
 0xa4b   : > { %v1716_v32 = vpop.xlane.xlu0 %1715 }
 0xa4c   : > { %2832 = vrcp.f32 %v1716_v32 }
 0xa4f   : > { %v1772_v33 = vpop.permute.xlu0 %1771 }
 0xa50   : > { %v1777_v35 = vsel %vm1067_vm4, %v1772_v33, 0 }
 0xa51   : > { %2632 = vmatpush3.bf16.msra.mxu0 %v1777_v35 }
 0xa52   : > { %2645 = vmatprep.subr.bf16.mxu0 %v3072_v12 }
 0xa55   : > { %v2831_v36 = vpop.eup %2830 }
 0xa56   : > { %v1719_v37 = vmul.f32 %v2831_v36, %v2827_v29  ;;  %v2797_v29 = vld [vmem:[%s3362_s29] sm:$0xff]  }
 0xa58   : > { %v1721_v38 = vpack.c.bf16 %v1719_v37, %v1719_v37 }
 0xa59   : > { %v2833_v39 = vpop.eup %2832 }
 0xa5a   : > { %2628 = vmatmul.mubr.msk.bf16.vlgmr.msra.gmra.mxu1 %vm942_vm3, %v1721_v38  ;;  %v1720_v40 = vmul.f32 %v2833_v39, %v2829_v2 }
 0xa5b   : > { %2641 = vmatprep.mubr.msk.bf16.mxu1 %vm3073_vm1, %v3072_v12  ;;  %2638 = vmatpush3.bf16.msra.mxu1 %v2794_v41  ;;  %v2466_v41 = vld [vmem:[%s665_s30] ss:$0 sm:$0xff] }
 0xa5c   : > { %v1722_v25 = vpack.c.bf16 %v1720_v40, %v1720_v40  ;;  %2639 = vmatprep.subr.bf16.mxu1 %v3072_v12 }
 0xa5e   : > { %2634 = vmatmul.mubr.msk.bf16.vlgmr.msra.gmra.mxu0 %vm942_vm3, %v1722_v25 }
 0xa5f   : > { %2649 = vmatprep.mubr.msk.bf16.mxu0 %vm3073_vm1, %v3072_v12  ;;  %2640 = vmatpush3.bf16.msra.mxu1 %v2795_v42 }
 0xa60   : > { %2653 = vmatprep.subr.bf16.mxu1 %v3072_v12 }
 0xb1a   : > { %v1765_v43 = vpop.f32.mrf.mxu1 }
 0xb1c   : > { %v2629_v44 = vpop.f32.mrf.mxu1 }
 0xb1e   : > { %v1768_v45 = vpop.f32.mrf.mxu1  ;;  %v1813_v46 = vpop.f32.mrf.mxu0 }
 0xb1f   : > { %v2787_v47 = vpack.i.bf16 %v1813_v46, %v1765_v43  ;;  %v2799_v46 = vld [vmem:[%s3372_s12 + $0x10] sm:$0xff]  }
 0xb20   : > { %v2630_v48 = vpop.f32.mrf.mxu1  ;;  %v2635_v49 = vpop.f32.mrf.mxu0 }
 0xb21   : > { %2788 = vrot.lane.b32.xlu0 %v2787_v47, %s3087_s20  ;;  %v2800_v47 = vld [vmem:[%s3372_s12 + $0x8] sm:$0xff]   ;;  %v2801_v48 = vld [vmem:[%s3372_s12] sm:$0xff]  }
 0xb22   : > { %v1816_v50 = vpop.f32.mrf.mxu0  ;;  %v2467_v49 = vld [vmem:[%s673_s26] ss:$0 sm:$0xff] }
 0xb24   : > { %v2636_v51 = vpop.f32.mrf.mxu0 }
 0xb93   : > { %v2789_v58 = vpop.permute.xlu0 %2788 }
 0xb94   : > { %v2791_v61 = vunpack.i.h.bf16 %v2789_v58  ;;  %v2790_v62 = vunpack.i.l.bf16 %v2789_v58 }
 0xb96   : > { %v1850_v4 = vsel %vm1848_vm6, %v1847_v1, %v2791_v61  ;;  %v1849_v5 = vsel %vm1848_vm6, %v1846_v0, %v2790_v62 }
 0xb97   : > { %v1851_v6 = vpack.c.bf16 %v1850_v4, %v1849_v5 }
 0xb99   : > { %2642 = vmatmul.mubr.msk.bf16.vlgmr.msra.gmra.mxu1 %vm878_vm2, %v1851_v6 }
 0xb9a   : > { %2661 = vmatprep.mubr.msk.bf16.mxu1 %vm3073_vm1, %v3072_v12  ;;  %2654 = vmatpush3.bf16.msra.mxu1 %v2798_v63 }
 0xb9b   : > { %2655 = vmatprep.subr.bf16.mxu1 %v3072_v12 }
 0xb9e   : > { %2656 = vmatpush3.bf16.msra.mxu1 %v2799_v46 }
 0xb9f   : > { %2657 = vmatprep.subr.bf16.mxu1 %v3072_v12 }
 0xba2   : > { %2658 = vmatpush3.bf16.msra.mxu1 %v2800_v47 }
 0xba3   : > { %2659 = vmatprep.subr.bf16.mxu1 %v3072_v12 }
 0xba6   : > { %2660 = vmatpush3.bf16.msra.mxu1 %v2801_v48 }
 0xc59   : > { %v1912_v7 = vpop.f32.mrf.mxu1 }
 0xc5a   : > { %v1913_v9 = vadd.f32 %v2461_v11, %v1912_v7 }
 0xc5b   : > { %v2643_v8 = vpop.f32.mrf.mxu1 }
 0xc5c   : > { %v1919_v10 = vadd.f32 %v1913_v9, %v3397_v14 }
 0xc5d   : > { %v1915_v13 = vpop.f32.mrf.mxu1 }
 0xc5e   : > { %v1916_v16 = vadd.f32 %v2461_v11, %v1915_v13  ;;  %v1923_v17 = vsel %vm878_vm2, %v1919_v10, 0.0 }
 0xc5f   : > { %1924 = vadd.xlane.f32.xlu1 %v1923_v17  ;;  %v2644_v18 = vpop.f32.mrf.mxu1 }
 0xc60   : > { %v1920_v19 = vadd.f32 %v1916_v16, %v3399_v15  ;;  %v2796_v15 = vld [vmem:[%s3362_s29 + $0x8] sm:$0xff]   ;;  %s3728_s29 = scalar_lea.vmem [#allocation7], %s3329_s25 }
 0xc61   : > { %2646 = vmatpush3.bf16.msra.mxu0 %v2796_v15  ;;  %v2465_v38 = vld [vmem:[%s3728_s29] ss:$0 sm:$0xff] }
 0xc62   : > { %v1926_v20 = vsel %vm878_vm2, %v1920_v19, 0.0  ;;  %2647 = vmatprep.subr.bf16.mxu0 %v3072_v12  ;;  %v2471_v12 = vld [vmem:[%s3730_s21] ss:$0 sm:$0xff] }
 0xc63   : > { %1927 = vadd.xlane.f32.xlu0 %v1926_v20 }
 0xc65   : > { %2648 = vmatpush3.bf16.msra.mxu0 %v2797_v29 }
 0xce8   : > { %v1925_v30 = vpop.xlane.xlu1 %1924 }
 0xce9   : > { %v1930_v34 = vmul.f32 0.03125, %v1925_v30 }
 0xceb   : > { %v1932_v22 = vsub.f32 %v1919_v10, %v1930_v34 }
 0xcec   : > { %v1928_v23 = vpop.xlane.xlu0 %1927 }
 0xced   : > { %v1931_v24 = vmul.f32 0.03125, %v1928_v23  ;;  %v1934_v14 = vmul.f32 %v1932_v22, %v1932_v22 }
 0xcef   : > { %v1933_v26 = vsub.f32 %v1920_v19, %v1931_v24  ;;  %v1936_v27 = vsel %vm878_vm2, %v1934_v14, 0.0 }
 0xcf0   : > { %1937 = vadd.xlane.f32.xlu0 %v1936_v27  ;;  %v2477_v27 = vld [vmem:[%s809_s18] ss:$0 sm:$0xff]  ;;  %s2978_s18 = scalar_lea.vmem %s2179_s9, 256 }
 0xcf1   : > { %v1935_v28 = vmul.f32 %v1933_v26, %v1933_v26  ;;  %p2979_p11 = scmp.ne.s32.totalorder %s2179_s9, %s2978_s18  ;;  %p2986_p10 = scmp.lt.s32.totalorder %s2978_s18, %s2978_s18 }
 0xcf3   : > { %v1939_v21 = vsel %vm878_vm2, %v1935_v28, 0.0  ;;  %p2980_p2 = pnand %p2979_p11, %p2705_p0  ;;  %p2987_p8 = por %p2986_p10, %p2985_p13 }
 0xcf4   : > { %1940 = vadd.xlane.f32.xlu1 %v1939_v21  ;;  %v2478_v21 = vld [vmem:[%s812_s13] ss:$0 sm:$0xff] }
 0xcf5   : > { %p2981_p12 = pneg %p2980_p2 }
 0xcf7   : > { %p2988_p1 = pnand %p2987_p8, %p2981_p12 }
 0xd79   : > { %v1938_v2 = vpop.xlane.xlu0 %1937 }
 0xd7a   : > { %v1942_v3 = vmul.f32 0.03125, %v1938_v2 }
 0xd7c   : > { %v1944_v31 = vadd.f32 1e-05, %v1942_v3 }
 0xd7d   : > { %v1941_v32 = vpop.xlane.xlu1 %1940 }
 0xd7e   : > { %2834 = vrsqrt.f32 %v1944_v31  ;;  %v1943_v33 = vmul.f32 0.03125, %v1941_v32 }
 0xd80   : > { %v1945_v35 = vadd.f32 1e-05, %v1943_v33 }
 0xd82   : > { %2836 = vrsqrt.f32 %v1945_v35 }
 0xd8b   : > { %v2835_v36 = vpop.eup %2834 }
 0xd8c   : > { %v1948_v37 = vmul.f32 %v2835_v36, %v1932_v22 }
 0xd8e   : > { %v1956_v25 = vmul.f32 %v2465_v38, %v1948_v37 }
 0xd8f   : > { %v2837_v39 = vpop.eup %2836 }
 0xd90   : > { %v1949_v40 = vmul.f32 %v2837_v39, %v1933_v26  ;;  %v1964_v43 = vadd.f32 %v2466_v41, %v1956_v25 }
 0xd92   : > { %v1957_v42 = vmul.f32 %v2465_v38, %v1949_v40 }
 0xd94   : > { %v1965_v44 = vadd.f32 %v2466_v41, %v1957_v42 }
 0xd96   : > { %v1966_v45 = vpack.c.bf16 %v1965_v44, %v1964_v43 }
 0xd98   : > { %2650 = vmatmul.mubr.msk.bf16.vlgmr.msra.gmra.mxu0 %vm878_vm2, %v1966_v45 }
 0xe58   : > { %v2027_v50 = vpop.f32.mrf.mxu0 }
 0xe59   : > { %v2028_v52 = vadd.f32 %v2467_v49, %v2027_v50 }
 0xe5a   : > { %v2651_v51 = vpop.f32.mrf.mxu0 }
 0xe5b   : > { %v2034_v56 = vmax.f32 %v2028_v52, 0.0 }
 0xe5c   : > { %v2030_v53 = vpop.f32.mrf.mxu0 }
 0xe5d   : > { %v2031_v54 = vadd.f32 %v2467_v49, %v2030_v53 }
 0xe5e   : > { %v2652_v55 = vpop.f32.mrf.mxu0 }
 0xe5f   : > { %v2035_v57 = vmax.f32 %v2031_v54, 0.0 }
 0xe61   : > { %v2036_v58 = vpack.c.bf16 %v2035_v57, %v2034_v56 }
 0xe63   : > { %2662 = vmatmul.mubr.msk.bf16.vlgmr.msra.gmra.mxu1 %vm2076_vm7, %v2036_v58 }
 0xf23   : > { %v2114_v59 = vpop.f32.mrf.mxu1 }
 0xf24   : > { %v2115_v60 = vadd.f32 %v2471_v12, %v2114_v59 }
 0xf25   : > { %v2663_v61 = vpop.f32.mrf.mxu1 }
 0xf26   : > { %v2121_v62 = vadd.f32 %v2115_v60, %v1964_v43 }
 0xf27   : > { %v2117_v0 = vpop.f32.mrf.mxu1 }
 0xf28   : > { %v2118_v1 = vadd.f32 %v2471_v12, %v2117_v0  ;;  %v2125_v4 = vsel %vm878_vm2, %v2121_v62, 0.0 }
 0xf29   : > { %2126 = vadd.xlane.f32.xlu0 %v2125_v4  ;;  %v2664_v5 = vpop.f32.mrf.mxu1 }
 0xf2a   : > { %v2122_v6 = vadd.f32 %v2118_v1, %v1965_v44 }
 0xf2c   : > { %v2128_v11 = vsel %vm878_vm2, %v2122_v6, 0.0 }
 0xf2d   : > { %2129 = vadd.xlane.f32.xlu1 %v2128_v11 }
 0xfb2   : > { %v2127_v7 = vpop.xlane.xlu0 %2126 }
 0xfb3   : > { %v2131_v9 = vmul.f32 0.03125, %v2127_v7 }
 0xfb5   : > { %v2133_v8 = vsub.f32 %v2121_v62, %v2131_v9 }
 0xfb6   : > { %v2130_v10 = vpop.xlane.xlu1 %2129 }
 0xfb7   : > { %v2132_v13 = vmul.f32 0.03125, %v2130_v10  ;;  %v2135_v16 = vmul.f32 %v2133_v8, %v2133_v8 }
 0xfb9   : > { %v2134_v17 = vsub.f32 %v2122_v6, %v2132_v13  ;;  %v2137_v18 = vsel %vm878_vm2, %v2135_v16, 0.0 }
 0xfba   : > { %2138 = vadd.xlane.f32.xlu0 %v2137_v18 }
 0xfbb   : > { %v2136_v19 = vmul.f32 %v2134_v17, %v2134_v17 }
 0xfbd   : > { %v2140_v20 = vsel %vm878_vm2, %v2136_v19, 0.0 }
 0xfbe   : > { %2141 = vadd.xlane.f32.xlu1 %v2140_v20 }
0x1043   : > { %v2139_v30 = vpop.xlane.xlu0 %2138 }
0x1044   : > { %v2143_v34 = vmul.f32 0.03125, %v2139_v30 }
0x1046   : > { %v2145_v22 = vadd.f32 1e-05, %v2143_v34 }
0x1047   : > { %v2142_v23 = vpop.xlane.xlu1 %2141 }
0x1048   : > { %2838 = vrsqrt.f32 %v2145_v22  ;;  %v2144_v24 = vmul.f32 0.03125, %v2142_v23 }
0x104a   : > { %v2146_v14 = vadd.f32 1e-05, %v2144_v24 }
0x104c   : > { %2840 = vrsqrt.f32 %v2146_v14 }
0x1055   : > { %v2839_v26 = vpop.eup %2838 }
0x1056   : > { %v2149_v28 = vmul.f32 %v2839_v26, %v2133_v8 }
0x1058   : > { %v2157_v15 = vmul.f32 %v2477_v27, %v2149_v28 }
0x1059   : > { %v2841_v29 = vpop.eup %2840 }
0x105a   : > { %v2150_v63 = vmul.f32 %v2841_v29, %v2134_v17  ;;  %v2165_v2 = vadd.f32 %v2478_v21, %v2157_v15 }
0x105c   : > { %v2158_v3 = vmul.f32 %v2477_v27, %v2150_v63  ;;  %2167 = vst.msk [vmem:[#allocation10] sm:$0xff] %vm878_vm2, %v2165_v2 }
0x105e   : > { %v2166_v31 = vadd.f32 %v2478_v21, %v2158_v3 }
0x1060   : > { %2168 = vst.msk [vmem:[#allocation10 + $0x8] sm:$0xff] %vm878_vm2, %v2166_v31 }
0x1061   : > { %2991 = shalt.err (!%p2988_p1)
}
0x1062   : > { %s3089_s16 = smov 128   ;;  %s3733_s14 = sld [smem:[#allocation32_spill]] }
0x1068   : > { %2680 = dma.vmem_to_hbm [thread:$0]  (%p2705_p0), %s2179_s9, 256, %s3733_s14, [#allocation4], %s3089_s16, %s3089_s16, %s3085_s24  }
0x1069   : > { %3039 = dma.done.wait (%p2705_p0), [#allocation4], 256  }
0x106a   : > { %3041 = vsyncadd (%p2705_p0), [#allocation4], 4294967040 }
0x106b PF: > { %s3734_s20 = sld [smem:[#allocation16_spill]]  ;;  %s3738_s21 = smov %s3048_s22 }
0x106c   : > { %s3735_s0 = sld [smem:[#allocation18_spill]]  ;;  %s3739_s22 = smov %s3052_s23 }
0x106d   : > { %s3736_s24 = sld [smem:[#allocation15_spill]] }
0x106e   : > { %s3737_s25 = sld [smem:[#allocation17_spill]] }
0x1071   : > { %s29_s26 = sadd.s32 1, %s3734_s20  }
0x1072   : > { %p26_p3 = scmp.ge.s32.totalorder %s29_s26, 4   ;;  %s3740_s23 = smov %s3735_s0 }
0x1074   :  { %28 = sbr.rel (!%p26_p3) target bundleno = 20 (0x14), region = 188 }
0x1079   :  { %2194 = vsyncpa [#allocation3], 1 }
0x107a   :  { %2196 = vsyncpa [#allocation3 + $0x1], 1 }
0x107b   :  { %2197 = vsyncpa [#allocation6], 1 }
0x107c   :  { %2198 = vsyncpa [#allocation4], 1 }
0x107d   :  { %2200 = vsyncpa [#allocation4 + $0x1], 1 }

</bundles_post_ra>
